<compile_context>
chip_gen: v7x
topology: tpu7x:2x2x1
jax: 0.10.0
libtpu: 0.0.40
codegen_flags: <defaults>
</compile_context>

<pallas_src>
import functools
from typing import NamedTuple, Tuple

import jax
import jax.numpy as jnp
from jax.experimental import pallas as pl
from jax.experimental.pallas import tpu as pltpu

_LANE = 128
_SUBLANE = 8
_RELUS = (True, True, True, False, True, True, True, False)
# Output slab layout: [x_bar | enc_h1 | enc_h2 | enc_h3 | z]
_OUT_LAYERS = (7, 0, 1, 2, 3)


def _round_up(v, m):
    return ((v + m - 1) // m) * m


class PackedAE(NamedTuple):
    weights: Tuple[jax.Array, ...]   # 8 x bf16 (in_pad128, out_pad128), zero padded
    bias_slab: jax.Array             # (1, total_bias) f32, lane-concatenated, zero padded
    in_dims: Tuple[int, ...]
    out_dims: Tuple[int, ...]
    in_pads: Tuple[int, ...]
    out_pads: Tuple[int, ...]
    b_offs: Tuple[int, ...]          # lane offset of each layer's bias in bias_slab
    out_offs: Tuple[int, ...]        # output-slab lane offset per layer in _OUT_LAYERS
    out_total: int


def pack_ae_params(params):
    """One-time pre-pack (hoisted out of the forward) of 8 (W, b) Linear params."""
    assert len(params) == 8
    in_dims = tuple(int(w.shape[0]) for w, _ in params)
    out_dims = tuple(int(w.shape[1]) for w, _ in params)
    for i in range(1, 8):
        assert in_dims[i] == out_dims[i - 1], "layer dims must chain"

    in_pads = tuple(_round_up(d, _LANE) for d in in_dims)
    out_pads = tuple(_round_up(d, _LANE) for d in out_dims)

    # Ragged per-layer bf16 weights, zero padded (padded rows/cols are inert).
    weights = []
    for (w, _), ip, op in zip(params, in_pads, out_pads):
        fi, fo = w.shape
        weights.append(jnp.pad(w.astype(jnp.bfloat16), ((0, ip - fi), (0, op - fo))))

    # Single lane-concatenated f32 bias row.
    b_offs, off = [], 0
    for op in out_pads:
        b_offs.append(off)
        off += op
    bias_slab = jnp.zeros((1, off), jnp.float32)
    for li, (_, b) in enumerate(params):
        fo = out_dims[li]
        bias_slab = bias_slab.at[:, b_offs[li]:b_offs[li] + fo].set(
            jnp.reshape(b, (1, fo)).astype(jnp.float32))

    out_offs, o = [], 0
    for li in _OUT_LAYERS:
        out_offs.append(o)
        o += out_pads[li]

    return PackedAE(weights=tuple(weights), bias_slab=bias_slab,
                    in_dims=in_dims, out_dims=out_dims,
                    in_pads=in_pads, out_pads=out_pads,
                    b_offs=tuple(b_offs), out_offs=tuple(out_offs), out_total=o)


def _ae_kernel(x_ref, *refs, layer_meta):
    """refs = (w0..w7, bias_slab, out_slab).

    layer_meta: per layer (bias_lane_off, out_pad, relu, out_slab_off | None).
    """
    w_refs = refs[:8]
    b_ref = refs[8]
    out_ref = refs[9]

    h = x_ref[...]                                     # bf16 (block_m, in_pad0)
    for li, (b_off, out_pad, relu, o_off) in enumerate(layer_meta):
        y = jnp.dot(h, w_refs[li][...], preferred_element_type=jnp.float32)
        y = y + b_ref[:, b_off:b_off + out_pad]        # f32 bias, static 128-aligned slice
        if relu:
            y = jnp.maximum(y, 0.0)
        if o_off is not None:
            # Lane-dense, 128-aligned store issued as soon as the value exists.
            out_ref[:, o_off:o_off + out_pad] = y
        h = y.astype(jnp.bfloat16)                     # bf16 chain into the next MXU pass


def ae_forward(x, packed: PackedAE, *, block_m=None):
    """Fused AE forward. Returns (x_bar, enc_h1, enc_h2, enc_h3, z)."""
    n, n_input = x.shape
    assert n_input == packed.in_dims[0]
    in_pad0 = packed.in_pads[0]
    out_total = packed.out_total

    # ---- hardware-aware tile size & VMEM budget ------------------------------
    try:
        vmem_cap = int(pltpu.get_tpu_info().vmem_capacity_bytes)
    except Exception:
        vmem_cap = 64 * 1024 * 1024          # conservative (v7x per-TC) default

    if block_m is None:
        block_m = 512 if vmem_cap >= (96 << 20) else 256
        # Prefer >= 2 grid tiles so the "parallel" batch axis can shard across
        # both TensorCores on 2-TC chips.
        two_tile = _round_up(-(-n // 2), _SUBLANE)
        block_m = min(block_m, max(_SUBLANE, two_tile))
    block_m = max(_SUBLANE, _round_up(min(block_m, max(n, 1)), _SUBLANE))

    n_pad = _round_up(n, block_m)
    grid = (n_pad // block_m,)

    # ---- x: cast to bf16, pad only when needed (single jnp.pad, no full rebuild)
    x_bf = x.astype(jnp.bfloat16)
    if n_pad != n or in_pad0 != n_input:
        # K-tail zeroing is required for correctness; M-tail rows are discarded.
        x_bf = jnp.pad(x_bf, ((0, n_pad - n), (0, in_pad0 - n_input)))

    # ---- cost / VMEM accounting from the actual ragged bf16 sizes ------------
    w_bytes = sum(int(w.size) * 2 for w in packed.weights)
    b_bytes = int(packed.bias_slab.size) * 4
    flops = int(2 * n_pad * sum(i * o for i, o in zip(packed.in_pads, packed.out_pads)))
    bytes_accessed = int(2 * n_pad * in_pad0 + w_bytes + b_bytes
                         + 4 * n_pad * out_total)
    cost = pl.CostEstimate(flops=flops, transcendentals=0,
                           bytes_accessed=bytes_accessed)

    max_out_pad = max(packed.out_pads)

    def _vmem_need(buffered_weights):
        w_mult = 1 if buffered_weights else 2
        return (2 * block_m * in_pad0 * 2              # double-buffered bf16 x tile
                + w_mult * (w_bytes + b_bytes)         # resident weights / bias
                + 2 * block_m * out_total * 4          # double-buffered f32 out slab
                + 6 * block_m * max_out_pad * 4)       # live f32/bf16 intermediates

    vmem_ceiling = (100 << 20) if vmem_cap >= (96 << 20) else (56 << 20)

    out_off_by_layer = {li: off for li, off in zip(_OUT_LAYERS, packed.out_offs)}
    layer_meta = tuple(
        (packed.b_offs[li], packed.out_pads[li], _RELUS[li], out_off_by_layer.get(li))
        for li in range(8))
    kernel = functools.partial(_ae_kernel, layer_meta=layer_meta)

    def _run(buffered_weights):
        if buffered_weights:
            w_specs = [pl.BlockSpec(tuple(w.shape), lambda i: (0, 0),
                                    pipeline_mode=pl.Buffered(1))
                       for w in packed.weights]
            b_spec = pl.BlockSpec(tuple(packed.bias_slab.shape), lambda i: (0, 0),
                                  pipeline_mode=pl.Buffered(1))
        else:
            w_specs = [pl.BlockSpec(tuple(w.shape), lambda i: (0, 0))
                       for w in packed.weights]
            b_spec = pl.BlockSpec(tuple(packed.bias_slab.shape), lambda i: (0, 0))

        vmem_need = _vmem_need(buffered_weights)
        vmem_limit = int(min(max(int(1.5 * vmem_need), 32 << 20), vmem_ceiling))

        return pl.pallas_call(
            kernel,
            out_shape=jax.ShapeDtypeStruct((n_pad, out_total), jnp.float32),
            grid_spec=pltpu.PrefetchScalarGridSpec(
                num_scalar_prefetch=0,
                grid=grid,
                in_specs=[pl.BlockSpec((block_m, in_pad0), lambda i: (i, 0))]
                         + w_specs + [b_spec],
                out_specs=pl.BlockSpec((block_m, out_total), lambda i: (i, 0)),
            ),
            compiler_params=pltpu.CompilerParams(
                dimension_semantics=("parallel",),
                vmem_limit_bytes=vmem_limit,
            ),
            cost_estimate=cost,
        )(x_bf, *packed.weights, packed.bias_slab)

    try:
        out_slab = _run(buffered_weights=True)
    except Exception:
        # pipeline_mode=pl.Buffered(1) not supported by this jax/libtpu build:
        # fall back to default (double-buffered) weight operands.
        out_slab = _run(buffered_weights=False)

    outs = []
    for li, off in zip(_OUT_LAYERS, packed.out_offs):
        outs.append(out_slab[:n, off:off + packed.out_dims[li]])
    x_bar, h1, h2, h3, z = outs
    return x_bar, h1, h2, h3, z


def init_linear(key, fan_in, fan_out):
    """PyTorch nn.Linear default init: U(-1/sqrt(fan_in), 1/sqrt(fan_in))."""
    kw, kb = jax.random.split(key)
    bound = 1.0 / jnp.sqrt(jnp.float32(fan_in))
    w = jax.random.uniform(kw, (fan_in, fan_out), jnp.float32, -bound, bound)
    b = jax.random.uniform(kb, (1, fan_out), jnp.float32, -bound, bound)
    return w, b


def reference_forward(x, params):
    """Mixed-precision reference matching the kernel's dtype flow
    (bf16 operands, f32 MXU accumulation, f32 bias/relu, bf16 chaining)."""
    def lin(h, w, b, relu):
        y = jnp.dot(h.astype(jnp.bfloat16), w.astype(jnp.bfloat16),
                    preferred_element_type=jnp.float32)
        y = y + jnp.reshape(b, (1, -1)).astype(jnp.float32)
        return jnp.maximum(y, 0.0) if relu else y

    h1 = lin(x, *params[0], True)
    h2 = lin(h1, *params[1], True)
    h3 = lin(h2, *params[2], True)
    z = lin(h3, *params[3], False)
    d1 = lin(z, *params[4], True)
    d2 = lin(d1, *params[5], True)
    d3 = lin(d2, *params[6], True)
    x_bar = lin(d3, *params[7], False)
    return x_bar, h1, h2, h3, z


if __name__ == "__main__":
    # AE(n_enc_1=32, n_enc_2=32, n_enc_3=64, n_dec_1=64, n_dec_2=32, n_dec_3=32,
    #    n_input=16, n_z=8), batch = 8.
    n_input, n_enc_1, n_enc_2, n_enc_3 = 16, 32, 32, 64
    n_z, n_dec_1, n_dec_2, n_dec_3 = 8, 64, 32, 32
    batch = 8

    key = jax.random.PRNGKey(0)
    keys = jax.random.split(key, 9)
    x = jax.random.normal(keys[0], (batch, n_input), jnp.float32)

    layer_dims = [
        (n_input, n_enc_1),   # enc_1
        (n_enc_1, n_enc_2),   # enc_2
        (n_enc_2, n_enc_3),   # enc_3
        (n_enc_3, n_z),       # z_layer
        (n_z, n_dec_1),       # dec_1
        (n_dec_1, n_dec_2),   # dec_2
        (n_dec_2, n_dec_3),   # dec_3
        (n_dec_3, n_input),   # x_bar_layer
    ]
    params = [init_linear(keys[i + 1], fi, fo) for i, (fi, fo) in enumerate(layer_dims)]

    packed = pack_ae_params(params)          # one-time pre-pack (not per forward)
    outs = jax.block_until_ready(ae_forward(x, packed))
    refs = reference_forward(x, params)

    names = ["x_bar", "enc_h1", "enc_h2", "enc_h3", "z"]
    for name, o, r in zip(names, outs, refs):
        assert o.shape == r.shape, (name, o.shape, r.shape)
        assert jnp.allclose(o, r, atol=1e-2, rtol=1e-2), (
            name, float(jnp.max(jnp.abs(o - r))))

    print("KERNEL_OK")
</pallas_src>

<mosaic_0001>
module attributes {stable_mosaic.version = 11 : i64} {
  func.func @_ae_kernel(%arg0: i32, %arg1: memref<8x128xbf16, #tpu.memory_space<vmem>>, %arg2: memref<128x128xbf16, #tpu.memory_space<vmem>>, %arg3: memref<128x128xbf16, #tpu.memory_space<vmem>>, %arg4: memref<128x128xbf16, #tpu.memory_space<vmem>>, %arg5: memref<128x128xbf16, #tpu.memory_space<vmem>>, %arg6: memref<128x128xbf16, #tpu.memory_space<vmem>>, %arg7: memref<128x128xbf16, #tpu.memory_space<vmem>>, %arg8: memref<128x128xbf16, #tpu.memory_space<vmem>>, %arg9: memref<128x128xbf16, #tpu.memory_space<vmem>>, %arg10: memref<1x1024xf32, #tpu.memory_space<vmem>>, %arg11: memref<8x640xf32, #tpu.memory_space<vmem>>) attributes {dimension_semantics = [#tpu.dimension_semantics<parallel>], iteration_bounds = array<i64: 1>, scalar_prefetch = 0 : i64, scratch_operands = 0 : i64, tpu.core_type = #tpu.core_type<tc>, window_params = [{transform_indices = @transform_0, window_bounds = array<i64: 8, 128>}, {pipeline_mode = #tpu.pipeline_mode<synchronous>, transform_indices = @transform_1, window_bounds = array<i64: 128, 128>}, {pipeline_mode = #tpu.pipeline_mode<synchronous>, transform_indices = @transform_2, window_bounds = array<i64: 128, 128>}, {pipeline_mode = #tpu.pipeline_mode<synchronous>, transform_indices = @transform_3, window_bounds = array<i64: 128, 128>}, {pipeline_mode = #tpu.pipeline_mode<synchronous>, transform_indices = @transform_4, window_bounds = array<i64: 128, 128>}, {pipeline_mode = #tpu.pipeline_mode<synchronous>, transform_indices = @transform_5, window_bounds = array<i64: 128, 128>}, {pipeline_mode = #tpu.pipeline_mode<synchronous>, transform_indices = @transform_6, window_bounds = array<i64: 128, 128>}, {pipeline_mode = #tpu.pipeline_mode<synchronous>, transform_indices = @transform_7, window_bounds = array<i64: 128, 128>}, {pipeline_mode = #tpu.pipeline_mode<synchronous>, transform_indices = @transform_8, window_bounds = array<i64: 128, 128>}, {pipeline_mode = #tpu.pipeline_mode<synchronous>, transform_indices = @transform_9, window_bounds = array<i64: 1, 1024>}, {transform_indices = @transform_10, window_bounds = array<i64: 8, 640>}]} {
    %c0 = arith.constant 0 : index
    %c0_0 = arith.constant 0 : index
    %0 = vector.load %arg1[%c0, %c0_0] : memref<8x128xbf16, #tpu.memory_space<vmem>>, vector<8x128xbf16>
    %c0_1 = arith.constant 0 : index
    %c0_2 = arith.constant 0 : index
    %1 = vector.load %arg2[%c0_1, %c0_2] : memref<128x128xbf16, #tpu.memory_space<vmem>>, vector<128x128xbf16>
    %cst = arith.constant dense<0.000000e+00> : vector<8x128xf32>
    %2 = tpu.matmul %0, %1, %cst {dimension_numbers = #tpu.dot_dimension_numbers<[1], [0], [0], [1], [0, 0, 1, 1], [], []>} : vector<8x128xbf16>, vector<128x128xbf16>, vector<8x128xf32> -> vector<8x128xf32>
    %c0_3 = arith.constant 0 : index
    %c0_4 = arith.constant 0 : index
    %3 = vector.load %arg10[%c0_3, %c0_4] : memref<1x1024xf32, #tpu.memory_space<vmem>>, vector<1x128xf32>
    %4 = vector.broadcast %3 : vector<1x128xf32> to vector<8x128xf32>
    %5 = arith.addf %2, %4 : vector<8x128xf32>
    %cst_5 = arith.constant 0.000000e+00 : f32
    %6 = vector.broadcast %cst_5 : f32 to vector<8x128xf32>
    %7 = arith.maximumf %5, %6 : vector<8x128xf32>
    %c0_6 = arith.constant 0 : index
    %c128 = arith.constant 128 : index
    %8 = vector.load %arg11[%c0_6, %c128] : memref<8x640xf32, #tpu.memory_space<vmem>>, vector<8x128xf32>
    tpu.vector_store %arg11[%c0_6, %c128], %7 {strides = array<i32>} : memref<8x640xf32, #tpu.memory_space<vmem>>, vector<8x128xf32>,
    %9 = arith.truncf %7 : vector<8x128xf32> to vector<8x128xbf16>
    %c0_7 = arith.constant 0 : index
    %c0_8 = arith.constant 0 : index
    %10 = vector.load %arg3[%c0_7, %c0_8] : memref<128x128xbf16, #tpu.memory_space<vmem>>, vector<128x128xbf16>
    %cst_9 = arith.constant dense<0.000000e+00> : vector<8x128xf32>
    %11 = tpu.matmul %9, %10, %cst_9 {dimension_numbers = #tpu.dot_dimension_numbers<[1], [0], [0], [1], [0, 0, 1, 1], [], []>} : vector<8x128xbf16>, vector<128x128xbf16>, vector<8x128xf32> -> vector<8x128xf32>
    %c0_10 = arith.constant 0 : index
    %c128_11 = arith.constant 128 : index
    %12 = vector.load %arg10[%c0_10, %c128_11] : memref<1x1024xf32, #tpu.memory_space<vmem>>, vector<1x128xf32>
    %13 = vector.broadcast %12 : vector<1x128xf32> to vector<8x128xf32>
    %14 = arith.addf %11, %13 : vector<8x128xf32>
    %cst_12 = arith.constant 0.000000e+00 : f32
    %15 = vector.broadcast %cst_12 : f32 to vector<8x128xf32>
    %16 = arith.maximumf %14, %15 : vector<8x128xf32>
    %c0_13 = arith.constant 0 : index
    %c256 = arith.constant 256 : index
    %17 = vector.load %arg11[%c0_13, %c256] : memref<8x640xf32, #tpu.memory_space<vmem>>, vector<8x128xf32>
    tpu.vector_store %arg11[%c0_13, %c256], %16 {strides = array<i32>} : memref<8x640xf32, #tpu.memory_space<vmem>>, vector<8x128xf32>,
    %18 = arith.truncf %16 : vector<8x128xf32> to vector<8x128xbf16>
    %c0_14 = arith.constant 0 : index
    %c0_15 = arith.constant 0 : index
    %19 = vector.load %arg4[%c0_14, %c0_15] : memref<128x128xbf16, #tpu.memory_space<vmem>>, vector<128x128xbf16>
    %cst_16 = arith.constant dense<0.000000e+00> : vector<8x128xf32>
    %20 = tpu.matmul %18, %19, %cst_16 {dimension_numbers = #tpu.dot_dimension_numbers<[1], [0], [0], [1], [0, 0, 1, 1], [], []>} : vector<8x128xbf16>, vector<128x128xbf16>, vector<8x128xf32> -> vector<8x128xf32>
    %c0_17 = arith.constant 0 : index
    %c256_18 = arith.constant 256 : index
    %21 = vector.load %arg10[%c0_17, %c256_18] : memref<1x1024xf32, #tpu.memory_space<vmem>>, vector<1x128xf32>
    %22 = vector.broadcast %21 : vector<1x128xf32> to vector<8x128xf32>
    %23 = arith.addf %20, %22 : vector<8x128xf32>
    %cst_19 = arith.constant 0.000000e+00 : f32
    %24 = vector.broadcast %cst_19 : f32 to vector<8x128xf32>
    %25 = arith.maximumf %23, %24 : vector<8x128xf32>
    %c0_20 = arith.constant 0 : index
    %c384 = arith.constant 384 : index
    %26 = vector.load %arg11[%c0_20, %c384] : memref<8x640xf32, #tpu.memory_space<vmem>>, vector<8x128xf32>
    tpu.vector_store %arg11[%c0_20, %c384], %25 {strides = array<i32>} : memref<8x640xf32, #tpu.memory_space<vmem>>, vector<8x128xf32>,
    %27 = arith.truncf %25 : vector<8x128xf32> to vector<8x128xbf16>
    %c0_21 = arith.constant 0 : index
    %c0_22 = arith.constant 0 : index
    %28 = vector.load %arg5[%c0_21, %c0_22] : memref<128x128xbf16, #tpu.memory_space<vmem>>, vector<128x128xbf16>
    %cst_23 = arith.constant dense<0.000000e+00> : vector<8x128xf32>
    %29 = tpu.matmul %27, %28, %cst_23 {dimension_numbers = #tpu.dot_dimension_numbers<[1], [0], [0], [1], [0, 0, 1, 1], [], []>} : vector<8x128xbf16>, vector<128x128xbf16>, vector<8x128xf32> -> vector<8x128xf32>
    %c0_24 = arith.constant 0 : index
    %c384_25 = arith.constant 384 : index
    %30 = vector.load %arg10[%c0_24, %c384_25] : memref<1x1024xf32, #tpu.memory_space<vmem>>, vector<1x128xf32>
    %31 = vector.broadcast %30 : vector<1x128xf32> to vector<8x128xf32>
    %32 = arith.addf %29, %31 : vector<8x128xf32>
    %c0_26 = arith.constant 0 : index
    %c512 = arith.constant 512 : index
    %33 = vector.load %arg11[%c0_26, %c512] : memref<8x640xf32, #tpu.memory_space<vmem>>, vector<8x128xf32>
    tpu.vector_store %arg11[%c0_26, %c512], %32 {strides = array<i32>} : memref<8x640xf32, #tpu.memory_space<vmem>>, vector<8x128xf32>,
    %34 = arith.truncf %32 : vector<8x128xf32> to vector<8x128xbf16>
    %c0_27 = arith.constant 0 : index
    %c0_28 = arith.constant 0 : index
    %35 = vector.load %arg6[%c0_27, %c0_28] : memref<128x128xbf16, #tpu.memory_space<vmem>>, vector<128x128xbf16>
    %cst_29 = arith.constant dense<0.000000e+00> : vector<8x128xf32>
    %36 = tpu.matmul %34, %35, %cst_29 {dimension_numbers = #tpu.dot_dimension_numbers<[1], [0], [0], [1], [0, 0, 1, 1], [], []>} : vector<8x128xbf16>, vector<128x128xbf16>, vector<8x128xf32> -> vector<8x128xf32>
    %c0_30 = arith.constant 0 : index
    %c512_31 = arith.constant 512 : index
    %37 = vector.load %arg10[%c0_30, %c512_31] : memref<1x1024xf32, #tpu.memory_space<vmem>>, vector<1x128xf32>
    %38 = vector.broadcast %37 : vector<1x128xf32> to vector<8x128xf32>
    %39 = arith.addf %36, %38 : vector<8x128xf32>
    %cst_32 = arith.constant 0.000000e+00 : f32
    %40 = vector.broadcast %cst_32 : f32 to vector<8x128xf32>
    %41 = arith.maximumf %39, %40 : vector<8x128xf32>
    %42 = arith.truncf %41 : vector<8x128xf32> to vector<8x128xbf16>
    %c0_33 = arith.constant 0 : index
    %c0_34 = arith.constant 0 : index
    %43 = vector.load %arg7[%c0_33, %c0_34] : memref<128x128xbf16, #tpu.memory_space<vmem>>, vector<128x128xbf16>
    %cst_35 = arith.constant dense<0.000000e+00> : vector<8x128xf32>
    %44 = tpu.matmul %42, %43, %cst_35 {dimension_numbers = #tpu.dot_dimension_numbers<[1], [0], [0], [1], [0, 0, 1, 1], [], []>} : vector<8x128xbf16>, vector<128x128xbf16>, vector<8x128xf32> -> vector<8x128xf32>
    %c0_36 = arith.constant 0 : index
    %c640 = arith.constant 640 : index
    %45 = vector.load %arg10[%c0_36, %c640] : memref<1x1024xf32, #tpu.memory_space<vmem>>, vector<1x128xf32>
    %46 = vector.broadcast %45 : vector<1x128xf32> to vector<8x128xf32>
    %47 = arith.addf %44, %46 : vector<8x128xf32>
    %cst_37 = arith.constant 0.000000e+00 : f32
    %48 = vector.broadcast %cst_37 : f32 to vector<8x128xf32>
    %49 = arith.maximumf %47, %48 : vector<8x128xf32>
    %50 = arith.truncf %49 : vector<8x128xf32> to vector<8x128xbf16>
    %c0_38 = arith.constant 0 : index
    %c0_39 = arith.constant 0 : index
    %51 = vector.load %arg8[%c0_38, %c0_39] : memref<128x128xbf16, #tpu.memory_space<vmem>>, vector<128x128xbf16>
    %cst_40 = arith.constant dense<0.000000e+00> : vector<8x128xf32>
    %52 = tpu.matmul %50, %51, %cst_40 {dimension_numbers = #tpu.dot_dimension_numbers<[1], [0], [0], [1], [0, 0, 1, 1], [], []>} : vector<8x128xbf16>, vector<128x128xbf16>, vector<8x128xf32> -> vector<8x128xf32>
    %c0_41 = arith.constant 0 : index
    %c768 = arith.constant 768 : index
    %53 = vector.load %arg10[%c0_41, %c768] : memref<1x1024xf32, #tpu.memory_space<vmem>>, vector<1x128xf32>
    %54 = vector.broadcast %53 : vector<1x128xf32> to vector<8x128xf32>
    %55 = arith.addf %52, %54 : vector<8x128xf32>
    %cst_42 = arith.constant 0.000000e+00 : f32
    %56 = vector.broadcast %cst_42 : f32 to vector<8x128xf32>
    %57 = arith.maximumf %55, %56 : vector<8x128xf32>
    %58 = arith.truncf %57 : vector<8x128xf32> to vector<8x128xbf16>
    %c0_43 = arith.constant 0 : index
    %c0_44 = arith.constant 0 : index
    %59 = vector.load %arg9[%c0_43, %c0_44] : memref<128x128xbf16, #tpu.memory_space<vmem>>, vector<128x128xbf16>
    %cst_45 = arith.constant dense<0.000000e+00> : vector<8x128xf32>
    %60 = tpu.matmul %58, %59, %cst_45 {dimension_numbers = #tpu.dot_dimension_numbers<[1], [0], [0], [1], [0, 0, 1, 1], [], []>} : vector<8x128xbf16>, vector<128x128xbf16>, vector<8x128xf32> -> vector<8x128xf32>
    %c0_46 = arith.constant 0 : index
    %c896 = arith.constant 896 : index
    %61 = vector.load %arg10[%c0_46, %c896] : memref<1x1024xf32, #tpu.memory_space<vmem>>, vector<1x128xf32>
    %62 = vector.broadcast %61 : vector<1x128xf32> to vector<8x128xf32>
    %63 = arith.addf %60, %62 : vector<8x128xf32>
    %c0_47 = arith.constant 0 : index
    %c0_48 = arith.constant 0 : index
    %64 = vector.load %arg11[%c0_47, %c0_48] : memref<8x640xf32, #tpu.memory_space<vmem>>, vector<8x128xf32>
    tpu.vector_store %arg11[%c0_47, %c0_48], %63 {strides = array<i32>} : memref<8x640xf32, #tpu.memory_space<vmem>>, vector<8x128xf32>,
    return
  }
  func.func @transform_0(%arg0: i32) -> (i32, i32) {
    %c0_i32 = arith.constant 0 : i32
    %c0_i32_0 = arith.constant 0 : i32
    return %arg0, %c0_i32 : i32, i32
  }
  func.func @transform_1(%arg0: i32) -> (i32, i32) {
    %c0_i32 = arith.constant 0 : i32
    %c0_i32_0 = arith.constant 0 : i32
    %c0_i32_1 = arith.constant 0 : i32
    return %c0_i32, %c0_i32_0 : i32, i32
  }
  func.func @transform_2(%arg0: i32) -> (i32, i32) {
    %c0_i32 = arith.constant 0 : i32
    %c0_i32_0 = arith.constant 0 : i32
    %c0_i32_1 = arith.constant 0 : i32
    return %c0_i32, %c0_i32_0 : i32, i32
  }
  func.func @transform_3(%arg0: i32) -> (i32, i32) {
    %c0_i32 = arith.constant 0 : i32
    %c0_i32_0 = arith.constant 0 : i32
    %c0_i32_1 = arith.constant 0 : i32
    return %c0_i32, %c0_i32_0 : i32, i32
  }
  func.func @transform_4(%arg0: i32) -> (i32, i32) {
    %c0_i32 = arith.constant 0 : i32
    %c0_i32_0 = arith.constant 0 : i32
    %c0_i32_1 = arith.constant 0 : i32
    return %c0_i32, %c0_i32_0 : i32, i32
  }
  func.func @transform_5(%arg0: i32) -> (i32, i32) {
    %c0_i32 = arith.constant 0 : i32
    %c0_i32_0 = arith.constant 0 : i32
    %c0_i32_1 = arith.constant 0 : i32
    return %c0_i32, %c0_i32_0 : i32, i32
  }
  func.func @transform_6(%arg0: i32) -> (i32, i32) {
    %c0_i32 = arith.constant 0 : i32
    %c0_i32_0 = arith.constant 0 : i32
    %c0_i32_1 = arith.constant 0 : i32
    return %c0_i32, %c0_i32_0 : i32, i32
  }
  func.func @transform_7(%arg0: i32) -> (i32, i32) {
    %c0_i32 = arith.constant 0 : i32
    %c0_i32_0 = arith.constant 0 : i32
    %c0_i32_1 = arith.constant 0 : i32
    return %c0_i32, %c0_i32_0 : i32, i32
  }
  func.func @transform_8(%arg0: i32) -> (i32, i32) {
    %c0_i32 = arith.constant 0 : i32
    %c0_i32_0 = arith.constant 0 : i32
    %c0_i32_1 = arith.constant 0 : i32
    return %c0_i32, %c0_i32_0 : i32, i32
  }
  func.func @transform_9(%arg0: i32) -> (i32, i32) {
    %c0_i32 = arith.constant 0 : i32
    %c0_i32_0 = arith.constant 0 : i32
    %c0_i32_1 = arith.constant 0 : i32
    return %c0_i32, %c0_i32_0 : i32, i32
  }
  func.func @transform_10(%arg0: i32) -> (i32, i32) {
    %c0_i32 = arith.constant 0 : i32
    %c0_i32_0 = arith.constant 0 : i32
    return %arg0, %c0_i32 : i32, i32
  }
}

module attributes {stable_mosaic.version = 11 : i64} {
  func.func @_ae_kernel(%arg0: i32, %arg1: memref<8x128xbf16, #tpu.memory_space<vmem>>, %arg2: memref<128x128xbf16, #tpu.memory_space<vmem>>, %arg3: memref<128x128xbf16, #tpu.memory_space<vmem>>, %arg4: memref<128x128xbf16, #tpu.memory_space<vmem>>, %arg5: memref<128x128xbf16, #tpu.memory_space<vmem>>, %arg6: memref<128x128xbf16, #tpu.memory_space<vmem>>, %arg7: memref<128x128xbf16, #tpu.memory_space<vmem>>, %arg8: memref<128x128xbf16, #tpu.memory_space<vmem>>, %arg9: memref<128x128xbf16, #tpu.memory_space<vmem>>, %arg10: memref<1x1024xf32, #tpu.memory_space<vmem>>, %arg11: memref<8x640xf32, #tpu.memory_space<vmem>>) attributes {dimension_semantics = [#tpu.dimension_semantics<parallel>], iteration_bounds = array<i64: 1>, scalar_prefetch = 0 : i64, scratch_operands = 0 : i64, tpu.core_type = #tpu.core_type<tc>, window_params = [{transform_indices = @transform_0, window_bounds = array<i64: 8, 128>}, {pipeline_mode = #tpu.pipeline_mode<synchronous>, transform_indices = @transform_1, window_bounds = array<i64: 128, 128>}, {pipeline_mode = #tpu.pipeline_mode<synchronous>, transform_indices = @transform_2, window_bounds = array<i64: 128, 128>}, {pipeline_mode = #tpu.pipeline_mode<synchronous>, transform_indices = @transform_3, window_bounds = array<i64: 128, 128>}, {pipeline_mode = #tpu.pipeline_mode<synchronous>, transform_indices = @transform_4, window_bounds = array<i64: 128, 128>}, {pipeline_mode = #tpu.pipeline_mode<synchronous>, transform_indices = @transform_5, window_bounds = array<i64: 128, 128>}, {pipeline_mode = #tpu.pipeline_mode<synchronous>, transform_indices = @transform_6, window_bounds = array<i64: 128, 128>}, {pipeline_mode = #tpu.pipeline_mode<synchronous>, transform_indices = @transform_7, window_bounds = array<i64: 128, 128>}, {pipeline_mode = #tpu.pipeline_mode<synchronous>, transform_indices = @transform_8, window_bounds = array<i64: 128, 128>}, {pipeline_mode = #tpu.pipeline_mode<synchronous>, transform_indices = @transform_9, window_bounds = array<i64: 1, 1024>}, {transform_indices = @transform_10, window_bounds = array<i64: 8, 640>}]} {
    %c0 = arith.constant 0 : index
    %c0_0 = arith.constant 0 : index
    %0 = vector.load %arg1[%c0, %c0_0] : memref<8x128xbf16, #tpu.memory_space<vmem>>, vector<8x128xbf16>
    %c0_1 = arith.constant 0 : index
    %c0_2 = arith.constant 0 : index
    %1 = vector.load %arg2[%c0_1, %c0_2] : memref<128x128xbf16, #tpu.memory_space<vmem>>, vector<128x128xbf16>
    %cst = arith.constant dense<0.000000e+00> : vector<8x128xf32>
    %2 = tpu.matmul %0, %1, %cst {dimension_numbers = #tpu.dot_dimension_numbers<[1], [0], [0], [1], [0, 0, 1, 1], [], []>} : vector<8x128xbf16>, vector<128x128xbf16>, vector<8x128xf32> -> vector<8x128xf32>
    %c0_3 = arith.constant 0 : index
    %c0_4 = arith.constant 0 : index
    %3 = vector.load %arg10[%c0_3, %c0_4] : memref<1x1024xf32, #tpu.memory_space<vmem>>, vector<1x128xf32>
    %4 = vector.broadcast %3 : vector<1x128xf32> to vector<8x128xf32>
    %5 = arith.addf %2, %4 : vector<8x128xf32>
    %cst_5 = arith.constant 0.000000e+00 : f32
    %6 = vector.broadcast %cst_5 : f32 to vector<8x128xf32>
    %7 = arith.maximumf %5, %6 : vector<8x128xf32>
    %c0_6 = arith.constant 0 : index
    %c128 = arith.constant 128 : index
    %8 = vector.load %arg11[%c0_6, %c128] : memref<8x640xf32, #tpu.memory_space<vmem>>, vector<8x128xf32>
    tpu.vector_store %arg11[%c0_6, %c128], %7 {strides = array<i32>} : memref<8x640xf32, #tpu.memory_space<vmem>>, vector<8x128xf32>,
    %9 = arith.truncf %7 : vector<8x128xf32> to vector<8x128xbf16>
    %c0_7 = arith.constant 0 : index
    %c0_8 = arith.constant 0 : index
    %10 = vector.load %arg3[%c0_7, %c0_8] : memref<128x128xbf16, #tpu.memory_space<vmem>>, vector<128x128xbf16>
    %cst_9 = arith.constant dense<0.000000e+00> : vector<8x128xf32>
    %11 = tpu.matmul %9, %10, %cst_9 {dimension_numbers = #tpu.dot_dimension_numbers<[1], [0], [0], [1], [0, 0, 1, 1], [], []>} : vector<8x128xbf16>, vector<128x128xbf16>, vector<8x128xf32> -> vector<8x128xf32>
    %c0_10 = arith.constant 0 : index
    %c128_11 = arith.constant 128 : index
    %12 = vector.load %arg10[%c0_10, %c128_11] : memref<1x1024xf32, #tpu.memory_space<vmem>>, vector<1x128xf32>
    %13 = vector.broadcast %12 : vector<1x128xf32> to vector<8x128xf32>
    %14 = arith.addf %11, %13 : vector<8x128xf32>
    %cst_12 = arith.constant 0.000000e+00 : f32
    %15 = vector.broadcast %cst_12 : f32 to vector<8x128xf32>
    %16 = arith.maximumf %14, %15 : vector<8x128xf32>
    %c0_13 = arith.constant 0 : index
    %c256 = arith.constant 256 : index
    %17 = vector.load %arg11[%c0_13, %c256] : memref<8x640xf32, #tpu.memory_space<vmem>>, vector<8x128xf32>
    tpu.vector_store %arg11[%c0_13, %c256], %16 {strides = array<i32>} : memref<8x640xf32, #tpu.memory_space<vmem>>, vector<8x128xf32>,
    %18 = arith.truncf %16 : vector<8x128xf32> to vector<8x128xbf16>
    %c0_14 = arith.constant 0 : index
    %c0_15 = arith.constant 0 : index
    %19 = vector.load %arg4[%c0_14, %c0_15] : memref<128x128xbf16, #tpu.memory_space<vmem>>, vector<128x128xbf16>
    %cst_16 = arith.constant dense<0.000000e+00> : vector<8x128xf32>
    %20 = tpu.matmul %18, %19, %cst_16 {dimension_numbers = #tpu.dot_dimension_numbers<[1], [0], [0], [1], [0, 0, 1, 1], [], []>} : vector<8x128xbf16>, vector<128x128xbf16>, vector<8x128xf32> -> vector<8x128xf32>
    %c0_17 = arith.constant 0 : index
    %c256_18 = arith.constant 256 : index
    %21 = vector.load %arg10[%c0_17, %c256_18] : memref<1x1024xf32, #tpu.memory_space<vmem>>, vector<1x128xf32>
    %22 = vector.broadcast %21 : vector<1x128xf32> to vector<8x128xf32>
    %23 = arith.addf %20, %22 : vector<8x128xf32>
    %cst_19 = arith.constant 0.000000e+00 : f32
    %24 = vector.broadcast %cst_19 : f32 to vector<8x128xf32>
    %25 = arith.maximumf %23, %24 : vector<8x128xf32>
    %c0_20 = arith.constant 0 : index
    %c384 = arith.constant 384 : index
    %26 = vector.load %arg11[%c0_20, %c384] : memref<8x640xf32, #tpu.memory_space<vmem>>, vector<8x128xf32>
    tpu.vector_store %arg11[%c0_20, %c384], %25 {strides = array<i32>} : memref<8x640xf32, #tpu.memory_space<vmem>>, vector<8x128xf32>,
    %27 = arith.truncf %25 : vector<8x128xf32> to vector<8x128xbf16>
    %c0_21 = arith.constant 0 : index
    %c0_22 = arith.constant 0 : index
    %28 = vector.load %arg5[%c0_21, %c0_22] : memref<128x128xbf16, #tpu.memory_space<vmem>>, vector<128x128xbf16>
    %cst_23 = arith.constant dense<0.000000e+00> : vector<8x128xf32>
    %29 = tpu.matmul %27, %28, %cst_23 {dimension_numbers = #tpu.dot_dimension_numbers<[1], [0], [0], [1], [0, 0, 1, 1], [], []>} : vector<8x128xbf16>, vector<128x128xbf16>, vector<8x128xf32> -> vector<8x128xf32>
    %c0_24 = arith.constant 0 : index
    %c384_25 = arith.constant 384 : index
    %30 = vector.load %arg10[%c0_24, %c384_25] : memref<1x1024xf32, #tpu.memory_space<vmem>>, vector<1x128xf32>
    %31 = vector.broadcast %30 : vector<1x128xf32> to vector<8x128xf32>
    %32 = arith.addf %29, %31 : vector<8x128xf32>
    %c0_26 = arith.constant 0 : index
    %c512 = arith.constant 512 : index
    %33 = vector.load %arg11[%c0_26, %c512] : memref<8x640xf32, #tpu.memory_space<vmem>>, vector<8x128xf32>
    tpu.vector_store %arg11[%c0_26, %c512], %32 {strides = array<i32>} : memref<8x640xf32, #tpu.memory_space<vmem>>, vector<8x128xf32>,
    %34 = arith.truncf %32 : vector<8x128xf32> to vector<8x128xbf16>
    %c0_27 = arith.constant 0 : index
    %c0_28 = arith.constant 0 : index
    %35 = vector.load %arg6[%c0_27, %c0_28] : memref<128x128xbf16, #tpu.memory_space<vmem>>, vector<128x128xbf16>
    %cst_29 = arith.constant dense<0.000000e+00> : vector<8x128xf32>
    %36 = tpu.matmul %34, %35, %cst_29 {dimension_numbers = #tpu.dot_dimension_numbers<[1], [0], [0], [1], [0, 0, 1, 1], [], []>} : vector<8x128xbf16>, vector<128x128xbf16>, vector<8x128xf32> -> vector<8x128xf32>
    %c0_30 = arith.constant 0 : index
    %c512_31 = arith.constant 512 : index
    %37 = vector.load %arg10[%c0_30, %c512_31] : memref<1x1024xf32, #tpu.memory_space<vmem>>, vector<1x128xf32>
    %38 = vector.broadcast %37 : vector<1x128xf32> to vector<8x128xf32>
    %39 = arith.addf %36, %38 : vector<8x128xf32>
    %cst_32 = arith.constant 0.000000e+00 : f32
    %40 = vector.broadcast %cst_32 : f32 to vector<8x128xf32>
    %41 = arith.maximumf %39, %40 : vector<8x128xf32>
    %42 = arith.truncf %41 : vector<8x128xf32> to vector<8x128xbf16>
    %c0_33 = arith.constant 0 : index
    %c0_34 = arith.constant 0 : index
    %43 = vector.load %arg7[%c0_33, %c0_34] : memref<128x128xbf16, #tpu.memory_space<vmem>>, vector<128x128xbf16>
    %cst_35 = arith.constant dense<0.000000e+00> : vector<8x128xf32>
    %44 = tpu.matmul %42, %43, %cst_35 {dimension_numbers = #tpu.dot_dimension_numbers<[1], [0], [0], [1], [0, 0, 1, 1], [], []>} : vector<8x128xbf16>, vector<128x128xbf16>, vector<8x128xf32> -> vector<8x128xf32>
    %c0_36 = arith.constant 0 : index
    %c640 = arith.constant 640 : index
    %45 = vector.load %arg10[%c0_36, %c640] : memref<1x1024xf32, #tpu.memory_space<vmem>>, vector<1x128xf32>
    %46 = vector.broadcast %45 : vector<1x128xf32> to vector<8x128xf32>
    %47 = arith.addf %44, %46 : vector<8x128xf32>
    %cst_37 = arith.constant 0.000000e+00 : f32
    %48 = vector.broadcast %cst_37 : f32 to vector<8x128xf32>
    %49 = arith.maximumf %47, %48 : vector<8x128xf32>
    %50 = arith.truncf %49 : vector<8x128xf32> to vector<8x128xbf16>
    %c0_38 = arith.constant 0 : index
    %c0_39 = arith.constant 0 : index
    %51 = vector.load %arg8[%c0_38, %c0_39] : memref<128x128xbf16, #tpu.memory_space<vmem>>, vector<128x128xbf16>
    %cst_40 = arith.constant dense<0.000000e+00> : vector<8x128xf32>
    %52 = tpu.matmul %50, %51, %cst_40 {dimension_numbers = #tpu.dot_dimension_numbers<[1], [0], [0], [1], [0, 0, 1, 1], [], []>} : vector<8x128xbf16>, vector<128x128xbf16>, vector<8x128xf32> -> vector<8x128xf32>
    %c0_41 = arith.constant 0 : index
    %c768 = arith.constant 768 : index
    %53 = vector.load %arg10[%c0_41, %c768] : memref<1x1024xf32, #tpu.memory_space<vmem>>, vector<1x128xf32>
    %54 = vector.broadcast %53 : vector<1x128xf32> to vector<8x128xf32>
    %55 = arith.addf %52, %54 : vector<8x128xf32>
    %cst_42 = arith.constant 0.000000e+00 : f32
    %56 = vector.broadcast %cst_42 : f32 to vector<8x128xf32>
    %57 = arith.maximumf %55, %56 : vector<8x128xf32>
    %58 = arith.truncf %57 : vector<8x128xf32> to vector<8x128xbf16>
    %c0_43 = arith.constant 0 : index
    %c0_44 = arith.constant 0 : index
    %59 = vector.load %arg9[%c0_43, %c0_44] : memref<128x128xbf16, #tpu.memory_space<vmem>>, vector<128x128xbf16>
    %cst_45 = arith.constant dense<0.000000e+00> : vector<8x128xf32>
    %60 = tpu.matmul %58, %59, %cst_45 {dimension_numbers = #tpu.dot_dimension_numbers<[1], [0], [0], [1], [0, 0, 1, 1], [], []>} : vector<8x128xbf16>, vector<128x128xbf16>, vector<8x128xf32> -> vector<8x128xf32>
    %c0_46 = arith.constant 0 : index
    %c896 = arith.constant 896 : index
    %61 = vector.load %arg10[%c0_46, %c896] : memref<1x1024xf32, #tpu.memory_space<vmem>>, vector<1x128xf32>
    %62 = vector.broadcast %61 : vector<1x128xf32> to vector<8x128xf32>
    %63 = arith.addf %60, %62 : vector<8x128xf32>
    %c0_47 = arith.constant 0 : index
    %c0_48 = arith.constant 0 : index
    %64 = vector.load %arg11[%c0_47, %c0_48] : memref<8x640xf32, #tpu.memory_space<vmem>>, vector<8x128xf32>
    tpu.vector_store %arg11[%c0_47, %c0_48], %63 {strides = array<i32>} : memref<8x640xf32, #tpu.memory_space<vmem>>, vector<8x128xf32>,
    return
  }
  func.func @transform_0(%arg0: i32) -> (i32, i32) {
    %c0_i32 = arith.constant 0 : i32
    %c0_i32_0 = arith.constant 0 : i32
    return %arg0, %c0_i32 : i32, i32
  }
  func.func @transform_1(%arg0: i32) -> (i32, i32) {
    %c0_i32 = arith.constant 0 : i32
    %c0_i32_0 = arith.constant 0 : i32
    %c0_i32_1 = arith.constant 0 : i32
    return %c0_i32, %c0_i32_0 : i32, i32
  }
  func.func @transform_2(%arg0: i32) -> (i32, i32) {
    %c0_i32 = arith.constant 0 : i32
    %c0_i32_0 = arith.constant 0 : i32
    %c0_i32_1 = arith.constant 0 : i32
    return %c0_i32, %c0_i32_0 : i32, i32
  }
  func.func @transform_3(%arg0: i32) -> (i32, i32) {
    %c0_i32 = arith.constant 0 : i32
    %c0_i32_0 = arith.constant 0 : i32
    %c0_i32_1 = arith.constant 0 : i32
    return %c0_i32, %c0_i32_0 : i32, i32
  }
  func.func @transform_4(%arg0: i32) -> (i32, i32) {
    %c0_i32 = arith.constant 0 : i32
    %c0_i32_0 = arith.constant 0 : i32
    %c0_i32_1 = arith.constant 0 : i32
    return %c0_i32, %c0_i32_0 : i32, i32
  }
  func.func @transform_5(%arg0: i32) -> (i32, i32) {
    %c0_i32 = arith.constant 0 : i32
    %c0_i32_0 = arith.constant 0 : i32
    %c0_i32_1 = arith.constant 0 : i32
    return %c0_i32, %c0_i32_0 : i32, i32
  }
  func.func @transform_6(%arg0: i32) -> (i32, i32) {
    %c0_i32 = arith.constant 0 : i32
    %c0_i32_0 = arith.constant 0 : i32
    %c0_i32_1 = arith.constant 0 : i32
    return %c0_i32, %c0_i32_0 : i32, i32
  }
  func.func @transform_7(%arg0: i32) -> (i32, i32) {
    %c0_i32 = arith.constant 0 : i32
    %c0_i32_0 = arith.constant 0 : i32
    %c0_i32_1 = arith.constant 0 : i32
    return %c0_i32, %c0_i32_0 : i32, i32
  }
  func.func @transform_8(%arg0: i32) -> (i32, i32) {
    %c0_i32 = arith.constant 0 : i32
    %c0_i32_0 = arith.constant 0 : i32
    %c0_i32_1 = arith.constant 0 : i32
    return %c0_i32, %c0_i32_0 : i32, i32
  }
  func.func @transform_9(%arg0: i32) -> (i32, i32) {
    %c0_i32 = arith.constant 0 : i32
    %c0_i32_0 = arith.constant 0 : i32
    %c0_i32_1 = arith.constant 0 : i32
    return %c0_i32, %c0_i32_0 : i32, i32
  }
  func.func @transform_10(%arg0: i32) -> (i32, i32) {
    %c0_i32 = arith.constant 0 : i32
    %c0_i32_0 = arith.constant 0 : i32
    return %arg0, %c0_i32 : i32, i32
  }
}

</mosaic_0001>

<bundles_post_ra>
// kernel: tpu_custom_call.1
= control target key start
LH: loop header
LB: loop body
LE: loop exit
PB: predicated region body
PF: predicated region fallthrough
CT: control target
= control target key end

     0   :  { %15 = vsyncpa [#allocation3], 0  ;;  %s2014_s0 = inlined_call_operand.hbm [shape: bf16[8,128], index: 0, kind: input, shape index: {}]   ;;  %s2015_s1 = inlined_call_operand.hbm [shape: bf16[128,128], index: 1, kind: input, shape index: {}]   ;;  %s2016_s2 = inlined_call_operand.hbm [shape: bf16[128,128], index: 2, kind: input, shape index: {}]   ;;  %s2017_s3 = inlined_call_operand.hbm [shape: bf16[128,128], index: 3, kind: input, shape index: {}]   ;;  %s2018_s4 = inlined_call_operand.hbm [shape: bf16[128,128], index: 4, kind: input, shape index: {}]   ;;  %s2019_s5 = inlined_call_operand.hbm [shape: bf16[128,128], index: 5, kind: input, shape index: {}]   ;;  %s2020_s6 = inlined_call_operand.hbm [shape: bf16[128,128], index: 6, kind: input, shape index: {}]   ;;  %s2021_s7 = inlined_call_operand.hbm [shape: bf16[128,128], index: 7, kind: input, shape index: {}]   ;;  %s2022_s8 = inlined_call_operand.hbm [shape: bf16[128,128], index: 8, kind: input, shape index: {}]   ;;  %s2023_s9 = inlined_call_operand.vmem [shape: f32[1,1024], index: 9, kind: input, shape index: {}]   ;;  %s2024_s10 = inlined_call_operand.hbm [shape: f32[8,640], index: 10, kind: output, shape index: {}]  }
   0x1   :  { %16 = vsyncpa [#allocation6], 0 }
   0x2   :  { %17 = vsyncpa [#allocation9], 0 }
   0x3   :  { %18 = vsyncpa [#allocation12], 0 }
   0x4   :  { %19 = vsyncpa [#allocation15], 0 }
   0x5   :  { %20 = vsyncpa [#allocation4], 0  ;;  %s1697_s13 = smov [#allocation5]   ;;  %s1465_s17 = scalar_lea.hbm %s2015_s1, 1024 }
   0x6   :  { %s36_s14 = sshll.u32 %s1697_s13, 4  ;;  %p1466_p0 = scmp.ne.s32.totalorder %s2015_s1, %s1465_s17  ;;  %s37_s14 = int_to_ptr.vmem [resolvable:$true] %s36_s14 }
   0x7   :  { %p1469_p1 = scmp.lt.u32.totalorder %s1465_s17, %s2015_s1 }
   0x9   :  { %p1471_p2 = pnand %p1469_p1, %p1466_p0 }
   0xb   :  { %1474 = shalt.err (!%p1471_p2)
}
   0xc   :  { %s1475_s22 = scalar_lea.vmem %s37_s14, 1024  ;;  %p1480_p4 = scmp.lt.s32.totalorder %s37_s14, %s37_s14 }
   0xd   :  { %p1476_p3 = scmp.ne.s32.totalorder %s37_s14, %s1475_s22  ;;  %p1481_p5 = scmp.lt.s32.totalorder %s1475_s22, %s1475_s22 }
   0xf   :  { %p1482_p6 = por %p1481_p5, %p1480_p4 }
  0x11   :  { %p1483_p7 = pnand %p1482_p6, %p1476_p3 }
  0x13   :  { %1486 = shalt.err (!%p1483_p7)
}
  0x14   :  { %s1698_s23 = smov 64   ;;  %s1699_s24 = smov 4  }
  0x15   :  { %42 = dma.hbm_to_vmem [thread:$0]  %s2015_s1, 1024, %s37_s14, [#allocation6], %s1698_s23, %s1698_s23, %s1699_s24  }
  0x16   :  { %s1700_s27 = smov [#allocation8]   ;;  %s1701_s29 = smov [#allocation11]  }
  0x17   :  { %s60_s28 = sshll.u32 %s1700_s27, 4  ;;  %s84_s30 = sshll.u32 %s1701_s29, 4  ;;  %s61_s28 = int_to_ptr.vmem [resolvable:$true] %s60_s28  ;;  %s85_s30 = int_to_ptr.vmem [resolvable:$true] %s84_s30 }
  0x18   :  { %s1487_s13 = scalar_lea.hbm %s2017_s3, 1024 }
  0x19   :  { %p1488_p8 = scmp.ne.s32.totalorder %s2017_s3, %s1487_s13  ;;  %p1491_p9 = scmp.lt.u32.totalorder %s1487_s13, %s2017_s3 }
  0x1b   :  { %p1493_p10 = pnand %p1491_p9, %p1488_p8 }
  0x1d   :  { %1496 = shalt.err (!%p1493_p10)
}
  0x1e   :  { %s1497_s1 = scalar_lea.vmem %s61_s28, 1024  ;;  %p1502_p12 = scmp.lt.s32.totalorder %s61_s28, %s61_s28 }
  0x1f   :  { %p1498_p11 = scmp.ne.s32.totalorder %s61_s28, %s1497_s1  ;;  %p1503_p13 = scmp.lt.s32.totalorder %s1497_s1, %s1497_s1 }
  0x21   :  { %p1504_p0 = por %p1503_p13, %p1502_p12 }
  0x23   :  { %p1505_p1 = pnand %p1504_p0, %p1498_p11 }
  0x25   :  { %1508 = shalt.err (!%p1505_p1)
}
  0x26   :  { %66 = dma.hbm_to_vmem [thread:$0]  %s2017_s3, 1024, %s61_s28, [#allocation9], %s1698_s23, %s1698_s23, %s1699_s24  }
  0x27   :  { %s1509_s22 = scalar_lea.hbm %s2019_s5, 1024 }
  0x28   :  { %p1510_p2 = scmp.ne.s32.totalorder %s2019_s5, %s1509_s22  ;;  %p1513_p3 = scmp.lt.u32.totalorder %s1509_s22, %s2019_s5 }
  0x2a   :  { %p1515_p4 = pnand %p1513_p3, %p1510_p2 }
  0x2c   :  { %1518 = shalt.err (!%p1515_p4)
}
  0x2d   :  { %s1519_s11 = scalar_lea.vmem %s85_s30, 1024  ;;  %p1524_p6 = scmp.lt.s32.totalorder %s85_s30, %s85_s30 }
  0x2e   :  { %p1520_p5 = scmp.ne.s32.totalorder %s85_s30, %s1519_s11  ;;  %p1525_p7 = scmp.lt.s32.totalorder %s1519_s11, %s1519_s11 }
  0x30   :  { %p1526_p8 = por %p1525_p7, %p1524_p6 }
  0x32   :  { %p1527_p9 = pnand %p1526_p8, %p1520_p5 }
  0x34   :  { %1530 = shalt.err (!%p1527_p9)
}
  0x35   :  { %90 = dma.hbm_to_vmem [thread:$0]  %s2019_s5, 1024, %s85_s30, [#allocation12], %s1698_s23, %s1698_s23, %s1699_s24  }
  0x36   :  { %s1702_s12 = smov [#allocation14]   ;;  %s1703_s15 = smov [#allocation2]  }
  0x37   :  { %s108_s13 = sshll.u32 %s1702_s12, 4  ;;  %s27_s16 = sshll.u32 %s1703_s15, 4  ;;  %s109_s13 = int_to_ptr.vmem [resolvable:$true] %s108_s13  ;;  %s28_s16 = int_to_ptr.vmem [resolvable:$true] %s27_s16 }
  0x38   :  { %s1531_s1 = scalar_lea.hbm %s2021_s7, 1024 }
  0x39   :  { %p1532_p10 = scmp.ne.s32.totalorder %s2021_s7, %s1531_s1  ;;  %p1535_p11 = scmp.lt.u32.totalorder %s1531_s1, %s2021_s7 }
  0x3b   :  { %p1537_p12 = pnand %p1535_p11, %p1532_p10 }
  0x3d   :  { %1540 = shalt.err (!%p1537_p12)
}
  0x3e   :  { %s1541_s5 = scalar_lea.vmem %s109_s13, 1024  ;;  %p1546_p0 = scmp.lt.s32.totalorder %s109_s13, %s109_s13 }
  0x3f   :  { %p1542_p13 = scmp.ne.s32.totalorder %s109_s13, %s1541_s5  ;;  %p1547_p1 = scmp.lt.s32.totalorder %s1541_s5, %s1541_s5 }
  0x41   :  { %p1548_p2 = por %p1547_p1, %p1546_p0 }
  0x43   :  { %p1549_p3 = pnand %p1548_p2, %p1542_p13 }
  0x45   :  { %1552 = shalt.err (!%p1549_p3)
}
  0x46   :  { %114 = dma.hbm_to_vmem [thread:$0]  %s2021_s7, 1024, %s109_s13, [#allocation15], %s1698_s23, %s1698_s23, %s1699_s24  }
  0x47   :  { %s1553_s27 = scalar_lea.hbm %s2014_s0, 64 }
  0x48   :  { %p1554_p4 = scmp.ne.s32.totalorder %s2014_s0, %s1553_s27  ;;  %p1557_p5 = scmp.lt.u32.totalorder %s1553_s27, %s2014_s0 }
  0x4a   :  { %p1559_p6 = pnand %p1557_p5, %p1554_p4 }
  0x4c   :  { %1562 = shalt.err (!%p1559_p6)
}
  0x4d   :  { %s1563_s12 = scalar_lea.vmem %s28_s16, 64  ;;  %p1568_p8 = scmp.lt.s32.totalorder %s28_s16, %s28_s16 }
  0x4e   :  { %p1564_p7 = scmp.ne.s32.totalorder %s28_s16, %s1563_s12  ;;  %p1569_p9 = scmp.lt.s32.totalorder %s1563_s12, %s1563_s12 }
  0x50   :  { %p1570_p10 = por %p1569_p9, %p1568_p8 }
  0x52   :  { %p1571_p11 = pnand %p1570_p10, %p1564_p7 }
  0x54   :  { %1574 = shalt.err (!%p1571_p11)
}
  0x55   :  { %30 = dma.hbm_to_vmem [thread:$0]  %s2014_s0, 64, %s28_s16, [#allocation3]  }
  0x56   :  { %s1704_s15 = smov [#allocation7]   ;;  %s1705_s18 = smov [#allocation10]  }
  0x57   :  { %s48_s17 = sshll.u32 %s1704_s15, 4  ;;  %s72_s1 = sshll.u32 %s1705_s18, 4  ;;  %s49_s17 = int_to_ptr.vmem [resolvable:$true] %s48_s17  ;;  %s73_s1 = int_to_ptr.vmem [resolvable:$true] %s72_s1 }
  0x58   :  { %s1575_s20 = scalar_lea.hbm %s2016_s2, 1024 }
  0x59   :  { %p1576_p12 = scmp.ne.s32.totalorder %s2016_s2, %s1575_s20  ;;  %p1579_p13 = scmp.lt.u32.totalorder %s1575_s20, %s2016_s2 }
  0x5b   :  { %p1581_p0 = pnand %p1579_p13, %p1576_p12 }
  0x5d   :  { %1584 = shalt.err (!%p1581_p0)
}
  0x5e   :  { %s1585_s0 = scalar_lea.vmem %s49_s17, 1024  ;;  %p1590_p2 = scmp.lt.s32.totalorder %s49_s17, %s49_s17 }
  0x5f   :  { %p1586_p1 = scmp.ne.s32.totalorder %s49_s17, %s1585_s0  ;;  %p1591_p3 = scmp.lt.s32.totalorder %s1585_s0, %s1585_s0 }
  0x61   :  { %p1592_p4 = por %p1591_p3, %p1590_p2 }
  0x63   :  { %p1593_p5 = pnand %p1592_p4, %p1586_p1 }
  0x65   :  { %1596 = shalt.err (!%p1593_p5)
}
  0x66   :  { %54 = dma.hbm_to_vmem [thread:$0]  %s2016_s2, 1024, %s49_s17, [#allocation6], %s1698_s23, %s1698_s23, %s1699_s24  }
  0x67   :  { %s1597_s29 = scalar_lea.hbm %s2018_s4, 1024 }
  0x68   :  { %p1598_p6 = scmp.ne.s32.totalorder %s2018_s4, %s1597_s29  ;;  %p1601_p7 = scmp.lt.u32.totalorder %s1597_s29, %s2018_s4 }
  0x6a   :  { %p1603_p8 = pnand %p1601_p7, %p1598_p6 }
  0x6c   :  { %1606 = shalt.err (!%p1603_p8)
}
  0x6d   :  { %s1607_s7 = scalar_lea.vmem %s73_s1, 1024  ;;  %p1612_p10 = scmp.lt.s32.totalorder %s73_s1, %s73_s1 }
  0x6e   :  { %p1608_p9 = scmp.ne.s32.totalorder %s73_s1, %s1607_s7  ;;  %p1613_p11 = scmp.lt.s32.totalorder %s1607_s7, %s1607_s7 }
  0x70   :  { %p1614_p12 = por %p1613_p11, %p1612_p10 }
  0x72   :  { %p1615_p13 = pnand %p1614_p12, %p1608_p9 }
  0x74   :  { %1618 = shalt.err (!%p1615_p13)
}
  0x75   :  { %78 = dma.hbm_to_vmem [thread:$0]  %s2018_s4, 1024, %s73_s1, [#allocation9], %s1698_s23, %s1698_s23, %s1699_s24  }
  0x76   :  { %s1706_s15 = smov [#allocation13]   ;;  %s1707_s18 = smov [#allocation16]  }
  0x77   :  { %s96_s17 = sshll.u32 %s1706_s15, 4  ;;  %s120_s14 = sshll.u32 %s1707_s18, 4  ;;  %s97_s17 = int_to_ptr.vmem [resolvable:$true] %s96_s17  ;;  %s121_s14 = int_to_ptr.vmem [resolvable:$true] %s120_s14 }
  0x78   :  { %s1619_s21 = scalar_lea.hbm %s2020_s6, 1024 }
  0x79   :  { %p1620_p0 = scmp.ne.s32.totalorder %s2020_s6, %s1619_s21  ;;  %p1623_p1 = scmp.lt.u32.totalorder %s1619_s21, %s2020_s6 }
  0x7b   :  { %p1625_p2 = pnand %p1623_p1, %p1620_p0 }
  0x7d   :  { %1628 = shalt.err (!%p1625_p2)
}
  0x7e   :  { %s1629_s4 = scalar_lea.vmem %s97_s17, 1024  ;;  %p1634_p4 = scmp.lt.s32.totalorder %s97_s17, %s97_s17 }
  0x7f   :  { %p1630_p3 = scmp.ne.s32.totalorder %s97_s17, %s1629_s4  ;;  %p1635_p5 = scmp.lt.s32.totalorder %s1629_s4, %s1629_s4 }
  0x81   :  { %p1636_p6 = por %p1635_p5, %p1634_p4 }
  0x83   :  { %p1637_p7 = pnand %p1636_p6, %p1630_p3 }
  0x85   :  { %1640 = shalt.err (!%p1637_p7)
}
  0x86   :  { %102 = dma.hbm_to_vmem [thread:$0]  %s2020_s6, 1024, %s97_s17, [#allocation12], %s1698_s23, %s1698_s23, %s1699_s24  }
  0x87   :  { %s1641_s27 = scalar_lea.hbm %s2022_s8, 1024 }
  0x88   :  { %p1642_p8 = scmp.ne.s32.totalorder %s2022_s8, %s1641_s27  ;;  %p1645_p9 = scmp.lt.u32.totalorder %s1641_s27, %s2022_s8 }
  0x8a   :  { %p1647_p10 = pnand %p1645_p9, %p1642_p8 }
  0x8c   :  { %1650 = shalt.err (!%p1647_p10)
}
  0x8d   :  { %s1651_s12 = scalar_lea.vmem %s121_s14, 1024  ;;  %p1656_p12 = scmp.lt.s32.totalorder %s121_s14, %s121_s14 }
  0x8e   :  { %p1652_p11 = scmp.ne.s32.totalorder %s121_s14, %s1651_s12  ;;  %p1657_p13 = scmp.lt.s32.totalorder %s1651_s12, %s1651_s12 }
  0x90   :  { %p1658_p0 = por %p1657_p13, %p1656_p12 }
  0x92   :  { %p1659_p1 = pnand %p1658_p0, %p1652_p11 }
  0x94   :  { %1662 = shalt.err (!%p1659_p1)
}
  0x95   :  { %126 = dma.hbm_to_vmem [thread:$0]  %s2022_s8, 1024, %s121_s14, [#allocation15], %s1698_s23, %s1698_s23, %s1699_s24  }
  0x96   :  { %1685 = dma.done.wait [#allocation3], 64  }
  0x97   :  { %1686 = vsyncadd [#allocation3], 4294967232 }
  0x98   :  { %1687 = dma.done.wait [#allocation6], 2048  }
  0x99   :  { %1688 = vsyncadd [#allocation6], 4294965248 }
  0x9a   :  { %1689 = dma.done.wait [#allocation9], 2048  }
  0x9b   :  { %1690 = vsyncadd [#allocation9], 4294965248 }
  0x9c   :  { %1691 = dma.done.wait [#allocation12], 2048  }
  0x9d   :  { %1692 = vsyncadd [#allocation12], 4294965248 }
  0x9e   :  { %1693 = dma.done.wait [#allocation15], 2048  }
  0x9f   :  { %1694 = vsyncadd [#allocation15], 4294965248  ;;  %v1708_v0 = vmov 0.0   ;;  %vm1709_vm0 = vmmov 0   ;;  %v1401_v1 = vld [vmem:[#allocation5] sm:$0xff]   ;;  %v1402_v2 = vld [vmem:[#allocation5 + $0x8] sm:$0xff]  }
  0xa0   :  { %1227 = vmatprep.subr.bf16.mxu0 %v1708_v0  ;;  %1243 = vmatprep.mubr.msk.bf16.mxu0 %vm1709_vm0, %v1708_v0  ;;  %v1403_v3 = vld [vmem:[#allocation5 + $0x10] sm:$0xff]   ;;  %v1409_v4 = vld [vmem:[#allocation7] sm:$0xff]   ;;  %v1404_v5 = vld [vmem:[#allocation5 + $0x18] sm:$0xff]   ;;  %s1710_s4 = smov [#allocation17]  }
  0xa1   :  { %1247 = vmatprep.subr.bf16.mxu1 %v1708_v0  ;;  %1263 = vmatprep.mubr.msk.bf16.mxu1 %vm1709_vm0, %v1708_v0  ;;  %v1410_v6 = vld [vmem:[#allocation7 + $0x8] sm:$0xff]   ;;  %v1405_v7 = vld [vmem:[#allocation5 + $0x20] sm:$0xff]   ;;  %v1411_v8 = vld [vmem:[#allocation7 + $0x10] sm:$0xff]   ;;  %s1070_s1 = sshll.u32 %s1710_s4, 4  ;;  %s1071_s1 = int_to_ptr.vmem [resolvable:$true] %s1070_s1 }
  0xa2   :  { %1228 = vmatpush3.bf16.msra.mxu0 %v1401_v1  ;;  %1248 = vmatpush3.bf16.msra.mxu1 %v1409_v4  ;;  %v1406_v9 = vld [vmem:[#allocation5 + $0x28] sm:$0xff]   ;;  %v1412_v10 = vld [vmem:[#allocation7 + $0x18] sm:$0xff]   ;;  %v1407_v11 = vld [vmem:[#allocation5 + $0x30] sm:$0xff]   ;;  %s1663_s16 = scalar_lea.vmem %s1071_s1, 640  ;;  %p1668_p3 = scmp.lt.s32.totalorder %s1071_s1, %s1071_s1 }
  0xa3   :  { %1229 = vmatprep.subr.bf16.mxu0 %v1708_v0  ;;  %1249 = vmatprep.subr.bf16.mxu1 %v1708_v0  ;;  %v1413_v12 = vld [vmem:[#allocation7 + $0x20] sm:$0xff]   ;;  %v1408_v13 = vld [vmem:[#allocation5 + $0x38] sm:$0xff]   ;;  %v1414_v14 = vld [vmem:[#allocation7 + $0x28] sm:$0xff]   ;;  %p1664_p2 = scmp.ne.s32.totalorder %s1071_s1, %s1663_s16  ;;  %p1669_p4 = scmp.lt.s32.totalorder %s1663_s16, %s1663_s16 }
  0xa4   :  { %v157_v15 = vld [vmem:[#allocation2] sm:$0xf]  ;;  %v1415_v16 = vld [vmem:[#allocation7 + $0x30] sm:$0xff]   ;;  %v1417_v18 = vld [vmem:[#allocation8] sm:$0xff]  }
  0xa5   :  { %v1416_v17 = vld [vmem:[#allocation7 + $0x38] sm:$0xff]   ;;  %v1418_v19 = vld [vmem:[#allocation8 + $0x8] sm:$0xff]   ;;  %v1419_v20 = vld [vmem:[#allocation8 + $0x10] sm:$0xff]   ;;  %p1670_p5 = por %p1669_p4, %p1668_p3 }
  0xa6   :  { %1230 = vmatpush3.bf16.msra.mxu0 %v1402_v2  ;;  %1250 = vmatpush3.bf16.msra.mxu1 %v1410_v6  ;;  %v1420_v21 = vld [vmem:[#allocation8 + $0x18] sm:$0xff]   ;;  %v1421_v22 = vld [vmem:[#allocation8 + $0x20] sm:$0xff]   ;;  %v1422_v23 = vld [vmem:[#allocation8 + $0x28] sm:$0xff]  }
  0xa7   :  { %1231 = vmatprep.subr.bf16.mxu0 %v1708_v0  ;;  %1251 = vmatprep.subr.bf16.mxu1 %v1708_v0  ;;  %v1083_v24 = vld [vmem:[%s2023_s9] ss:$0 sm:$0xff]  ;;  %v1424_v33 = vld [vmem:[#allocation8 + $0x38] sm:$0xff]   ;;  %v1425_v34 = vld [vmem:[#allocation10] sm:$0xff]   ;;  %p1671_p6 = pnand %p1670_p5, %p1664_p2 }
  0xa8   :  { %v1423_v32 = vld [vmem:[#allocation8 + $0x30] sm:$0xff]   ;;  %v1426_v35 = vld [vmem:[#allocation10 + $0x8] sm:$0xff]   ;;  %v1428_v37 = vld [vmem:[#allocation10 + $0x18] sm:$0xff]  }
  0xa9   :  { %v1427_v36 = vld [vmem:[#allocation10 + $0x10] sm:$0xff]   ;;  %v1429_v38 = vld [vmem:[#allocation10 + $0x20] sm:$0xff]   ;;  %v1430_v39 = vld [vmem:[#allocation10 + $0x28] sm:$0xff]  }
  0xaa   :  { %1232 = vmatpush3.bf16.msra.mxu0 %v1403_v3  ;;  %1252 = vmatpush3.bf16.msra.mxu1 %v1411_v8  ;;  %v1092_v40 = vld [vmem:[%s2023_s9 + $0x1] ss:$0 sm:$0xff]  ;;  %v1432_v49 = vld [vmem:[#allocation10 + $0x38] sm:$0xff]   ;;  %v1433_v50 = vld [vmem:[#allocation11] sm:$0xff]  }
  0xab   :  { %1233 = vmatprep.subr.bf16.mxu0 %v1708_v0  ;;  %1253 = vmatprep.subr.bf16.mxu1 %v1708_v0  ;;  %v1431_v48 = vld [vmem:[#allocation10 + $0x30] sm:$0xff]   ;;  %v1434_v51 = vld [vmem:[#allocation11 + $0x8] sm:$0xff]   ;;  %v1436_v53 = vld [vmem:[#allocation11 + $0x18] sm:$0xff]  }
  0xac   :  { %v1435_v52 = vld [vmem:[#allocation11 + $0x10] sm:$0xff]   ;;  %v1437_v54 = vld [vmem:[#allocation11 + $0x20] sm:$0xff]   ;;  %v1438_v55 = vld [vmem:[#allocation11 + $0x28] sm:$0xff]  }
  0xad   :  { %v1439_v56 = vld [vmem:[#allocation11 + $0x30] sm:$0xff]   ;;  %v1440_v2 = vld [vmem:[#allocation11 + $0x38] sm:$0xff]   ;;  %v1441_v3 = vld [vmem:[#allocation13] sm:$0xff]  }
  0xae   :  { %1234 = vmatpush3.bf16.msra.mxu0 %v1404_v5  ;;  %1254 = vmatpush3.bf16.msra.mxu1 %v1412_v10  ;;  %v1101_v57 = vld [vmem:[%s2023_s9 + $0x2] ss:$0 sm:$0xff]  ;;  %v1442_v4 = vld [vmem:[#allocation13 + $0x8] sm:$0xff]   ;;  %v1444_v6 = vld [vmem:[#allocation13 + $0x18] sm:$0xff]  }
  0xaf   :  { %1235 = vmatprep.subr.bf16.mxu0 %v1708_v0  ;;  %1255 = vmatprep.subr.bf16.mxu1 %v1708_v0  ;;  %v1443_v5 = vld [vmem:[#allocation13 + $0x10] sm:$0xff]   ;;  %v1446_v8 = vld [vmem:[#allocation13 + $0x28] sm:$0xff]  }
  0xb2   :  { %1236 = vmatpush3.bf16.msra.mxu0 %v1405_v7  ;;  %1256 = vmatpush3.bf16.msra.mxu1 %v1413_v12  ;;  %v1445_v7 = vld [vmem:[#allocation13 + $0x20] sm:$0xff]  }
  0xb3   :  { %1237 = vmatprep.subr.bf16.mxu0 %v1708_v0  ;;  %1257 = vmatprep.subr.bf16.mxu1 %v1708_v0 }
  0xb6   :  { %1238 = vmatpush3.bf16.msra.mxu0 %v1406_v9  ;;  %1258 = vmatpush3.bf16.msra.mxu1 %v1414_v14  ;;  %v1110_v9 = vld [vmem:[%s2023_s9 + $0x3] ss:$0 sm:$0xff] }
  0xb7   :  { %1239 = vmatprep.subr.bf16.mxu0 %v1708_v0  ;;  %1259 = vmatprep.subr.bf16.mxu1 %v1708_v0 }
  0xba   :  { %1240 = vmatpush3.bf16.msra.mxu0 %v1407_v11  ;;  %1260 = vmatpush3.bf16.msra.mxu1 %v1415_v16  ;;  %v1447_v16 = vld [vmem:[#allocation13 + $0x30] sm:$0xff]  }
  0xbb   :  { %1241 = vmatprep.subr.bf16.mxu0 %v1708_v0  ;;  %1261 = vmatprep.subr.bf16.mxu1 %v1708_v0 }
  0xbe   :  { %1242 = vmatpush3.bf16.msra.mxu0 %v1408_v13  ;;  %1262 = vmatpush3.bf16.msra.mxu1 %v1416_v17  ;;  %v1448_v17 = vld [vmem:[#allocation13 + $0x38] sm:$0xff]  }
  0xbf   :  { %1267 = vmatprep.subr.bf16.mxu0 %v1708_v0  ;;  %1287 = vmatprep.subr.bf16.mxu1 %v1708_v0 }
  0xc1   :  { %1244 = vmatmul.mubr.bf16.vlgmr.msra.gmra.mrb[0].mxu0 %v157_v15 }
  0xc2   :  { %1283 = vmatprep.mubr.msk.bf16.mxu0 %vm1709_vm0, %v1708_v0  ;;  %1268 = vmatpush3.bf16.msra.mxu0 %v1417_v18  ;;  %v1449_v18 = vld [vmem:[#allocation14] sm:$0xff]  }
  0xc3   :  { %1269 = vmatprep.subr.bf16.mxu0 %v1708_v0 }
  0xc6   :  { %1270 = vmatpush3.bf16.msra.mxu0 %v1418_v19  ;;  %v1450_v19 = vld [vmem:[#allocation14 + $0x8] sm:$0xff]  }
  0xc7   :  { %1271 = vmatprep.subr.bf16.mxu0 %v1708_v0 }
  0xca   :  { %1272 = vmatpush3.bf16.msra.mxu0 %v1419_v20  ;;  %v1451_v20 = vld [vmem:[#allocation14 + $0x10] sm:$0xff]  }
  0xcb   :  { %1273 = vmatprep.subr.bf16.mxu0 %v1708_v0 }
  0xce   :  { %1274 = vmatpush3.bf16.msra.mxu0 %v1420_v21  ;;  %v1452_v21 = vld [vmem:[#allocation14 + $0x18] sm:$0xff]  }
  0xcf   :  { %1275 = vmatprep.subr.bf16.mxu0 %v1708_v0 }
  0xd2   :  { %1276 = vmatpush3.bf16.msra.mxu0 %v1421_v22  ;;  %v1453_v22 = vld [vmem:[#allocation14 + $0x20] sm:$0xff]  }
  0xd3   :  { %1277 = vmatprep.subr.bf16.mxu0 %v1708_v0 }
  0xd6   :  { %1278 = vmatpush3.bf16.msra.mxu0 %v1422_v23  ;;  %v1454_v23 = vld [vmem:[#allocation14 + $0x28] sm:$0xff]  }
  0xd7   :  { %1279 = vmatprep.subr.bf16.mxu0 %v1708_v0 }
  0xda   :  { %1280 = vmatpush3.bf16.msra.mxu0 %v1423_v32  ;;  %v1455_v32 = vld [vmem:[#allocation14 + $0x30] sm:$0xff]  }
  0xdb   :  { %1281 = vmatprep.subr.bf16.mxu0 %v1708_v0 }
  0xde   :  { %1282 = vmatpush3.bf16.msra.mxu0 %v1424_v33  ;;  %v1456_v33 = vld [vmem:[#allocation14 + $0x38] sm:$0xff]  }
  0xdf   :  { %1307 = vmatprep.subr.bf16.mxu0 %v1708_v0 }
 0x194   :  { %v263_v25 = vpop.f32.mrb[0].mxu0 }
 0x195   :  { %v264_v26 = vadd.f32 %v1083_v24, %v263_v25  ;;  %v1245_v27 = vpop.f32.mrb[1].mxu0  ;;  %v1119_v24 = vld [vmem:[%s2023_s9 + $0x4] ss:$0 sm:$0xff] }
 0x196   :  { %v266_v28 = vpop.f32.mrb[2].mxu0 }
 0x197   :  { %v269_v29 = vmax.f32 %v264_v26, 0.0  ;;  %v1246_v30 = vpop.f32.mrb[3].mxu0 }
 0x199   :  { %270 = vst [vmem:[#allocation17 + $0x8] sm:$0xff] %v269_v29  ;;  %v271_v31 = vpack.c.bf16 %v269_v29, %v269_v29 }
 0x19b   :  { %1264 = vmatmul.mubr.bf16.vlgmr.msra.gmra.mrb[0].mxu1 %v271_v31 }
 0x19c   :  { %1303 = vmatprep.mubr.msk.bf16.mxu1 %vm1709_vm0, %v1708_v0  ;;  %1288 = vmatpush3.bf16.msra.mxu1 %v1425_v34  ;;  %v1457_v34 = vld [vmem:[#allocation16] sm:$0xff]  }
 0x19d   :  { %1289 = vmatprep.subr.bf16.mxu1 %v1708_v0 }
 0x1a0   :  { %1290 = vmatpush3.bf16.msra.mxu1 %v1426_v35  ;;  %v1458_v35 = vld [vmem:[#allocation16 + $0x8] sm:$0xff]  }
 0x1a1   :  { %1291 = vmatprep.subr.bf16.mxu1 %v1708_v0 }
 0x1a4   :  { %1292 = vmatpush3.bf16.msra.mxu1 %v1427_v36  ;;  %v1459_v36 = vld [vmem:[#allocation16 + $0x10] sm:$0xff]  }
 0x1a5   :  { %1293 = vmatprep.subr.bf16.mxu1 %v1708_v0 }
 0x1a8   :  { %1294 = vmatpush3.bf16.msra.mxu1 %v1428_v37  ;;  %v1460_v37 = vld [vmem:[#allocation16 + $0x18] sm:$0xff]  }
 0x1a9   :  { %1295 = vmatprep.subr.bf16.mxu1 %v1708_v0 }
 0x1ac   :  { %1296 = vmatpush3.bf16.msra.mxu1 %v1429_v38  ;;  %v1461_v38 = vld [vmem:[#allocation16 + $0x20] sm:$0xff]  }
 0x1ad   :  { %1297 = vmatprep.subr.bf16.mxu1 %v1708_v0 }
 0x1b0   :  { %1298 = vmatpush3.bf16.msra.mxu1 %v1430_v39  ;;  %v1462_v39 = vld [vmem:[#allocation16 + $0x28] sm:$0xff]  }
 0x1b1   :  { %1299 = vmatprep.subr.bf16.mxu1 %v1708_v0 }
 0x1b4   :  { %1300 = vmatpush3.bf16.msra.mxu1 %v1431_v48  ;;  %v1463_v48 = vld [vmem:[#allocation16 + $0x30] sm:$0xff]  }
 0x1b5   :  { %1301 = vmatprep.subr.bf16.mxu1 %v1708_v0 }
 0x1b8   :  { %1302 = vmatpush3.bf16.msra.mxu1 %v1432_v49  ;;  %v1464_v49 = vld [vmem:[#allocation16 + $0x38] sm:$0xff]  }
 0x1b9   :  { %1327 = vmatprep.subr.bf16.mxu1 %v1708_v0 }
 0x26e   :  { %v377_v41 = vpop.f32.mrb[0].mxu1 }
 0x26f   :  { %v378_v42 = vadd.f32 %v1092_v40, %v377_v41  ;;  %v1265_v43 = vpop.f32.mrb[1].mxu1  ;;  %v1128_v40 = vld [vmem:[%s2023_s9 + $0x5] ss:$0 sm:$0xff] }
 0x270   :  { %v380_v44 = vpop.f32.mrb[2].mxu1 }
 0x271   :  { %v383_v45 = vmax.f32 %v378_v42, 0.0  ;;  %v1266_v46 = vpop.f32.mrb[3].mxu1 }
 0x273   :  { %384 = vst [vmem:[#allocation17 + $0x10] sm:$0xff] %v383_v45  ;;  %v385_v47 = vpack.c.bf16 %v383_v45, %v383_v45 }
 0x275   :  { %1284 = vmatmul.mubr.bf16.vlgmr.msra.gmra.mrb[4].mxu0 %v385_v47 }
 0x276   :  { %1323 = vmatprep.mubr.msk.bf16.mxu0 %vm1709_vm0, %v1708_v0  ;;  %1308 = vmatpush3.bf16.msra.mxu0 %v1433_v50  ;;  %v1137_v50 = vld [vmem:[%s2023_s9 + $0x6] ss:$0 sm:$0xff] }
 0x277   :  { %1309 = vmatprep.subr.bf16.mxu0 %v1708_v0 }
 0x27a   :  { %1310 = vmatpush3.bf16.msra.mxu0 %v1434_v51 }
 0x27b   :  { %1311 = vmatprep.subr.bf16.mxu0 %v1708_v0 }
 0x27e   :  { %1312 = vmatpush3.bf16.msra.mxu0 %v1435_v52 }
 0x27f   :  { %1313 = vmatprep.subr.bf16.mxu0 %v1708_v0 }
 0x282   :  { %1314 = vmatpush3.bf16.msra.mxu0 %v1436_v53 }
 0x283   :  { %1315 = vmatprep.subr.bf16.mxu0 %v1708_v0 }
 0x286   :  { %1316 = vmatpush3.bf16.msra.mxu0 %v1437_v54 }
 0x287   :  { %1317 = vmatprep.subr.bf16.mxu0 %v1708_v0 }
 0x28a   :  { %1318 = vmatpush3.bf16.msra.mxu0 %v1438_v55 }
 0x28b   :  { %1319 = vmatprep.subr.bf16.mxu0 %v1708_v0 }
 0x28e   :  { %1320 = vmatpush3.bf16.msra.mxu0 %v1439_v56 }
 0x28f   :  { %1321 = vmatprep.subr.bf16.mxu0 %v1708_v0 }
 0x292   :  { %1322 = vmatpush3.bf16.msra.mxu0 %v1440_v2 }
 0x293   :  { %1347 = vmatprep.subr.bf16.mxu0 %v1708_v0 }
 0x348   :  { %v491_v58 = vpop.f32.mrb[4].mxu0 }
 0x349   :  { %v492_v59 = vadd.f32 %v1101_v57, %v491_v58  ;;  %v1285_v60 = vpop.f32.mrb[5].mxu0  ;;  %v1146_v58 = vld [vmem:[%s2023_s9 + $0x7] ss:$0 sm:$0xff] }
 0x34a   :  { %v494_v61 = vpop.f32.mrb[6].mxu0 }
 0x34b   :  { %v497_v62 = vmax.f32 %v492_v59, 0.0  ;;  %v1286_v63 = vpop.f32.mrb[7].mxu0 }
 0x34d   :  { %498 = vst [vmem:[#allocation17 + $0x18] sm:$0xff] %v497_v62  ;;  %v499_v1 = vpack.c.bf16 %v497_v62, %v497_v62 }
 0x34f   :  { %1304 = vmatmul.mubr.bf16.vlgmr.msra.gmra.mrb[4].mxu1 %v499_v1 }
 0x350   :  { %1343 = vmatprep.mubr.msk.bf16.mxu1 %vm1709_vm0, %v1708_v0  ;;  %1328 = vmatpush3.bf16.msra.mxu1 %v1441_v3 }
 0x351   :  { %1329 = vmatprep.subr.bf16.mxu1 %v1708_v0 }
 0x354   :  { %1330 = vmatpush3.bf16.msra.mxu1 %v1442_v4 }
 0x355   :  { %1331 = vmatprep.subr.bf16.mxu1 %v1708_v0 }
 0x358   :  { %1332 = vmatpush3.bf16.msra.mxu1 %v1443_v5 }
 0x359   :  { %1333 = vmatprep.subr.bf16.mxu1 %v1708_v0 }
 0x35c   :  { %1334 = vmatpush3.bf16.msra.mxu1 %v1444_v6 }
 0x35d   :  { %1335 = vmatprep.subr.bf16.mxu1 %v1708_v0 }
 0x360   :  { %1336 = vmatpush3.bf16.msra.mxu1 %v1445_v7 }
 0x361   :  { %1337 = vmatprep.subr.bf16.mxu1 %v1708_v0 }
 0x364   :  { %1338 = vmatpush3.bf16.msra.mxu1 %v1446_v8 }
 0x365   :  { %1339 = vmatprep.subr.bf16.mxu1 %v1708_v0 }
 0x368   :  { %1340 = vmatpush3.bf16.msra.mxu1 %v1447_v16 }
 0x369   :  { %1341 = vmatprep.subr.bf16.mxu1 %v1708_v0 }
 0x36c   :  { %1342 = vmatpush3.bf16.msra.mxu1 %v1448_v17 }
 0x36d   :  { %1367 = vmatprep.subr.bf16.mxu1 %v1708_v0 }
 0x422   :  { %v605_v10 = vpop.f32.mrb[4].mxu1 }
 0x423   :  { %v606_v11 = vadd.f32 %v1110_v9, %v605_v10  ;;  %v1305_v12 = vpop.f32.mrb[5].mxu1 }
 0x424   :  { %v608_v13 = vpop.f32.mrb[6].mxu1 }
 0x425   :  { %611 = vst [vmem:[#allocation17 + $0x20] sm:$0xff] %v606_v11  ;;  %v612_v14 = vpack.c.bf16 %v606_v11, %v606_v11  ;;  %v1306_v15 = vpop.f32.mrb[7].mxu1 }
 0x427   :  { %1324 = vmatmul.mubr.bf16.vlgmr.msra.gmra.mrb[8].mxu0 %v612_v14 }
 0x428   :  { %1363 = vmatprep.mubr.msk.bf16.mxu0 %vm1709_vm0, %v1708_v0  ;;  %1348 = vmatpush3.bf16.msra.mxu0 %v1449_v18 }
 0x429   :  { %1349 = vmatprep.subr.bf16.mxu0 %v1708_v0 }
 0x42c   :  { %1350 = vmatpush3.bf16.msra.mxu0 %v1450_v19 }
 0x42d   :  { %1351 = vmatprep.subr.bf16.mxu0 %v1708_v0 }
 0x430   :  { %1352 = vmatpush3.bf16.msra.mxu0 %v1451_v20 }
 0x431   :  { %1353 = vmatprep.subr.bf16.mxu0 %v1708_v0 }
 0x434   :  { %1354 = vmatpush3.bf16.msra.mxu0 %v1452_v21 }
 0x435   :  { %1355 = vmatprep.subr.bf16.mxu0 %v1708_v0 }
 0x438   :  { %1356 = vmatpush3.bf16.msra.mxu0 %v1453_v22 }
 0x439   :  { %1357 = vmatprep.subr.bf16.mxu0 %v1708_v0 }
 0x43c   :  { %1358 = vmatpush3.bf16.msra.mxu0 %v1454_v23 }
 0x43d   :  { %1359 = vmatprep.subr.bf16.mxu0 %v1708_v0 }
 0x440   :  { %1360 = vmatpush3.bf16.msra.mxu0 %v1455_v32 }
 0x441   :  { %1361 = vmatprep.subr.bf16.mxu0 %v1708_v0 }
 0x444   :  { %1362 = vmatpush3.bf16.msra.mxu0 %v1456_v33 }
 0x4fa   :  { %v718_v25 = vpop.f32.mrb[8].mxu0 }
 0x4fb   :  { %v719_v26 = vadd.f32 %v1119_v24, %v718_v25  ;;  %v1325_v27 = vpop.f32.mrb[9].mxu0 }
 0x4fc   :  { %v721_v28 = vpop.f32.mrb[10].mxu0 }
 0x4fd   :  { %v724_v29 = vmax.f32 %v719_v26, 0.0  ;;  %v1326_v30 = vpop.f32.mrb[11].mxu0 }
 0x4ff   :  { %v725_v31 = vpack.c.bf16 %v724_v29, %v724_v29 }
 0x501   :  { %1344 = vmatmul.mubr.bf16.vlgmr.msra.gmra.mrb[8].mxu1 %v725_v31 }
 0x502   :  { %1383 = vmatprep.mubr.msk.bf16.mxu1 %vm1709_vm0, %v1708_v0  ;;  %1368 = vmatpush3.bf16.msra.mxu1 %v1457_v34 }
 0x503   :  { %1369 = vmatprep.subr.bf16.mxu1 %v1708_v0 }
 0x506   :  { %1370 = vmatpush3.bf16.msra.mxu1 %v1458_v35 }
 0x507   :  { %1371 = vmatprep.subr.bf16.mxu1 %v1708_v0 }
 0x50a   :  { %1372 = vmatpush3.bf16.msra.mxu1 %v1459_v36 }
 0x50b   :  { %1373 = vmatprep.subr.bf16.mxu1 %v1708_v0 }
 0x50e   :  { %1374 = vmatpush3.bf16.msra.mxu1 %v1460_v37 }
 0x50f   :  { %1375 = vmatprep.subr.bf16.mxu1 %v1708_v0 }
 0x512   :  { %1376 = vmatpush3.bf16.msra.mxu1 %v1461_v38 }
 0x513   :  { %1377 = vmatprep.subr.bf16.mxu1 %v1708_v0 }
 0x516   :  { %1378 = vmatpush3.bf16.msra.mxu1 %v1462_v39 }
 0x517   :  { %1379 = vmatprep.subr.bf16.mxu1 %v1708_v0 }
 0x51a   :  { %1380 = vmatpush3.bf16.msra.mxu1 %v1463_v48 }
 0x51b   :  { %1381 = vmatprep.subr.bf16.mxu1 %v1708_v0 }
 0x51e   :  { %1382 = vmatpush3.bf16.msra.mxu1 %v1464_v49 }
 0x5d4   :  { %v831_v41 = vpop.f32.mrb[8].mxu1 }
 0x5d5   :  { %v832_v42 = vadd.f32 %v1128_v40, %v831_v41  ;;  %v1345_v43 = vpop.f32.mrb[9].mxu1 }
 0x5d6   :  { %v834_v44 = vpop.f32.mrb[10].mxu1 }
 0x5d7   :  { %v837_v45 = vmax.f32 %v832_v42, 0.0  ;;  %v1346_v46 = vpop.f32.mrb[11].mxu1 }
 0x5d9   :  { %v838_v47 = vpack.c.bf16 %v837_v45, %v837_v45 }
 0x5db   :  { %1364 = vmatmul.mubr.bf16.vlgmr.msra.gmra.mrb[12].mxu0 %v838_v47 }
 0x6ae   :  { %v944_v51 = vpop.f32.mrb[12].mxu0 }
 0x6af   :  { %v945_v52 = vadd.f32 %v1137_v50, %v944_v51  ;;  %v1365_v53 = vpop.f32.mrb[13].mxu0 }
 0x6b0   :  { %v947_v54 = vpop.f32.mrb[14].mxu0 }
 0x6b1   :  { %v950_v55 = vmax.f32 %v945_v52, 0.0  ;;  %v1366_v56 = vpop.f32.mrb[15].mxu0 }
 0x6b3   :  { %v951_v57 = vpack.c.bf16 %v950_v55, %v950_v55 }
 0x6b5   :  { %1384 = vmatmul.mubr.bf16.vlgmr.msra.gmra.mrb[12].mxu1 %v951_v57 }
 0x788   :  { %v1057_v0 = vpop.f32.mrb[12].mxu1 }
 0x789   :  { %v1058_v59 = vadd.f32 %v1146_v58, %v1057_v0  ;;  %v1385_v60 = vpop.f32.mrb[13].mxu1 }
 0x78a   :  { %v1060_v61 = vpop.f32.mrb[14].mxu1 }
 0x78b   :  { %1063 = vst [vmem:[#allocation17] sm:$0xff] %v1058_v59  ;;  %v1386_v62 = vpop.f32.mrb[15].mxu1 }
 0x78c   :  { %1674 = shalt.err (!%p1671_p6)
}
 0x78d   :  { %s1675_s9 = scalar_lea.hbm %s2024_s10, 640 }
 0x78e   :  { %p1676_p7 = scmp.ne.s32.totalorder %s2024_s10, %s1675_s9  ;;  %p1679_p8 = scmp.lt.u32.totalorder %s1675_s9, %s2024_s10 }
 0x790   :  { %p1681_p9 = pnand %p1679_p8, %p1676_p7 }
 0x792   :  { %1684 = shalt.err (!%p1681_p9)
}
 0x793   :  { %1073 = dma.vmem_to_hbm [thread:$0]  %s1071_s1, 640, %s2024_s10, [#allocation4]  }
 0x794   :  { %1695 = dma.done.wait [#allocation4], 640  }
 0x795   :  { %1696 = vsyncadd [#allocation4], 4294966656 }
 0x796   :  { %1077 = vsyncpa [#allocation3], 1 }
 0x797   :  { %1078 = vsyncpa [#allocation6], 1 }
 0x798   :  { %1079 = vsyncpa [#allocation9], 1 }
 0x799   :  { %1080 = vsyncpa [#allocation12], 1 }
 0x79a   :  { %1081 = vsyncpa [#allocation15], 1 }
 0x79b   :  { %1082 = vsyncpa [#allocation4], 1 }

// kernel: tpu_custom_call.1
= control target key start
LH: loop header
LB: loop body
LE: loop exit
PB: predicated region body
PF: predicated region fallthrough
CT: control target
= control target key end

     0   :  { %15 = vsyncpa [#allocation3], 0  ;;  %s2014_s0 = inlined_call_operand.hbm [shape: bf16[8,128], index: 0, kind: input, shape index: {}]   ;;  %s2015_s1 = inlined_call_operand.hbm [shape: bf16[128,128], index: 1, kind: input, shape index: {}]   ;;  %s2016_s2 = inlined_call_operand.hbm [shape: bf16[128,128], index: 2, kind: input, shape index: {}]   ;;  %s2017_s3 = inlined_call_operand.hbm [shape: bf16[128,128], index: 3, kind: input, shape index: {}]   ;;  %s2018_s4 = inlined_call_operand.hbm [shape: bf16[128,128], index: 4, kind: input, shape index: {}]   ;;  %s2019_s5 = inlined_call_operand.hbm [shape: bf16[128,128], index: 5, kind: input, shape index: {}]   ;;  %s2020_s6 = inlined_call_operand.hbm [shape: bf16[128,128], index: 6, kind: input, shape index: {}]   ;;  %s2021_s7 = inlined_call_operand.hbm [shape: bf16[128,128], index: 7, kind: input, shape index: {}]   ;;  %s2022_s8 = inlined_call_operand.hbm [shape: bf16[128,128], index: 8, kind: input, shape index: {}]   ;;  %s2023_s9 = inlined_call_operand.vmem [shape: f32[1,1024], index: 9, kind: input, shape index: {}]   ;;  %s2024_s10 = inlined_call_operand.hbm [shape: f32[8,640], index: 10, kind: output, shape index: {}]  }
   0x1   :  { %16 = vsyncpa [#allocation6], 0 }
   0x2   :  { %17 = vsyncpa [#allocation9], 0 }
   0x3   :  { %18 = vsyncpa [#allocation12], 0 }
   0x4   :  { %19 = vsyncpa [#allocation15], 0 }
   0x5   :  { %20 = vsyncpa [#allocation4], 0  ;;  %s1697_s13 = smov [#allocation5]   ;;  %s1465_s17 = scalar_lea.hbm %s2015_s1, 1024 }
   0x6   :  { %s36_s14 = sshll.u32 %s1697_s13, 4  ;;  %p1466_p0 = scmp.ne.s32.totalorder %s2015_s1, %s1465_s17  ;;  %s37_s14 = int_to_ptr.vmem [resolvable:$true] %s36_s14 }
   0x7   :  { %p1469_p1 = scmp.lt.u32.totalorder %s1465_s17, %s2015_s1 }
   0x9   :  { %p1471_p2 = pnand %p1469_p1, %p1466_p0 }
   0xb   :  { %1474 = shalt.err (!%p1471_p2)
}
   0xc   :  { %s1475_s22 = scalar_lea.vmem %s37_s14, 1024  ;;  %p1480_p4 = scmp.lt.s32.totalorder %s37_s14, %s37_s14 }
   0xd   :  { %p1476_p3 = scmp.ne.s32.totalorder %s37_s14, %s1475_s22  ;;  %p1481_p5 = scmp.lt.s32.totalorder %s1475_s22, %s1475_s22 }
   0xf   :  { %p1482_p6 = por %p1481_p5, %p1480_p4 }
  0x11   :  { %p1483_p7 = pnand %p1482_p6, %p1476_p3 }
  0x13   :  { %1486 = shalt.err (!%p1483_p7)
}
  0x14   :  { %s1698_s23 = smov 64   ;;  %s1699_s24 = smov 4  }
  0x15   :  { %42 = dma.hbm_to_vmem [thread:$0]  %s2015_s1, 1024, %s37_s14, [#allocation6], %s1698_s23, %s1698_s23, %s1699_s24  }
  0x16   :  { %s1700_s27 = smov [#allocation8]   ;;  %s1701_s29 = smov [#allocation11]  }
  0x17   :  { %s60_s28 = sshll.u32 %s1700_s27, 4  ;;  %s84_s30 = sshll.u32 %s1701_s29, 4  ;;  %s61_s28 = int_to_ptr.vmem [resolvable:$true] %s60_s28  ;;  %s85_s30 = int_to_ptr.vmem [resolvable:$true] %s84_s30 }
  0x18   :  { %s1487_s13 = scalar_lea.hbm %s2017_s3, 1024 }
  0x19   :  { %p1488_p8 = scmp.ne.s32.totalorder %s2017_s3, %s1487_s13  ;;  %p1491_p9 = scmp.lt.u32.totalorder %s1487_s13, %s2017_s3 }
  0x1b   :  { %p1493_p10 = pnand %p1491_p9, %p1488_p8 }
  0x1d   :  { %1496 = shalt.err (!%p1493_p10)
}
  0x1e   :  { %s1497_s1 = scalar_lea.vmem %s61_s28, 1024  ;;  %p1502_p12 = scmp.lt.s32.totalorder %s61_s28, %s61_s28 }
  0x1f   :  { %p1498_p11 = scmp.ne.s32.totalorder %s61_s28, %s1497_s1  ;;  %p1503_p13 = scmp.lt.s32.totalorder %s1497_s1, %s1497_s1 }
  0x21   :  { %p1504_p0 = por %p1503_p13, %p1502_p12 }
  0x23   :  { %p1505_p1 = pnand %p1504_p0, %p1498_p11 }
  0x25   :  { %1508 = shalt.err (!%p1505_p1)
}
  0x26   :  { %66 = dma.hbm_to_vmem [thread:$0]  %s2017_s3, 1024, %s61_s28, [#allocation9], %s1698_s23, %s1698_s23, %s1699_s24  }
  0x27   :  { %s1509_s22 = scalar_lea.hbm %s2019_s5, 1024 }
  0x28   :  { %p1510_p2 = scmp.ne.s32.totalorder %s2019_s5, %s1509_s22  ;;  %p1513_p3 = scmp.lt.u32.totalorder %s1509_s22, %s2019_s5 }
  0x2a   :  { %p1515_p4 = pnand %p1513_p3, %p1510_p2 }
  0x2c   :  { %1518 = shalt.err (!%p1515_p4)
}
  0x2d   :  { %s1519_s11 = scalar_lea.vmem %s85_s30, 1024  ;;  %p1524_p6 = scmp.lt.s32.totalorder %s85_s30, %s85_s30 }
  0x2e   :  { %p1520_p5 = scmp.ne.s32.totalorder %s85_s30, %s1519_s11  ;;  %p1525_p7 = scmp.lt.s32.totalorder %s1519_s11, %s1519_s11 }
  0x30   :  { %p1526_p8 = por %p1525_p7, %p1524_p6 }
  0x32   :  { %p1527_p9 = pnand %p1526_p8, %p1520_p5 }
  0x34   :  { %1530 = shalt.err (!%p1527_p9)
}
  0x35   :  { %90 = dma.hbm_to_vmem [thread:$0]  %s2019_s5, 1024, %s85_s30, [#allocation12], %s1698_s23, %s1698_s23, %s1699_s24  }
  0x36   :  { %s1702_s12 = smov [#allocation14]   ;;  %s1703_s15 = smov [#allocation2]  }
  0x37   :  { %s108_s13 = sshll.u32 %s1702_s12, 4  ;;  %s27_s16 = sshll.u32 %s1703_s15, 4  ;;  %s109_s13 = int_to_ptr.vmem [resolvable:$true] %s108_s13  ;;  %s28_s16 = int_to_ptr.vmem [resolvable:$true] %s27_s16 }
  0x38   :  { %s1531_s1 = scalar_lea.hbm %s2021_s7, 1024 }
  0x39   :  { %p1532_p10 = scmp.ne.s32.totalorder %s2021_s7, %s1531_s1  ;;  %p1535_p11 = scmp.lt.u32.totalorder %s1531_s1, %s2021_s7 }
  0x3b   :  { %p1537_p12 = pnand %p1535_p11, %p1532_p10 }
  0x3d   :  { %1540 = shalt.err (!%p1537_p12)
}
  0x3e   :  { %s1541_s5 = scalar_lea.vmem %s109_s13, 1024  ;;  %p1546_p0 = scmp.lt.s32.totalorder %s109_s13, %s109_s13 }
  0x3f   :  { %p1542_p13 = scmp.ne.s32.totalorder %s109_s13, %s1541_s5  ;;  %p1547_p1 = scmp.lt.s32.totalorder %s1541_s5, %s1541_s5 }
  0x41   :  { %p1548_p2 = por %p1547_p1, %p1546_p0 }
  0x43   :  { %p1549_p3 = pnand %p1548_p2, %p1542_p13 }
  0x45   :  { %1552 = shalt.err (!%p1549_p3)
}
  0x46   :  { %114 = dma.hbm_to_vmem [thread:$0]  %s2021_s7, 1024, %s109_s13, [#allocation15], %s1698_s23, %s1698_s23, %s1699_s24  }
  0x47   :  { %s1553_s27 = scalar_lea.hbm %s2014_s0, 64 }
  0x48   :  { %p1554_p4 = scmp.ne.s32.totalorder %s2014_s0, %s1553_s27  ;;  %p1557_p5 = scmp.lt.u32.totalorder %s1553_s27, %s2014_s0 }
  0x4a   :  { %p1559_p6 = pnand %p1557_p5, %p1554_p4 }
  0x4c   :  { %1562 = shalt.err (!%p1559_p6)
}
  0x4d   :  { %s1563_s12 = scalar_lea.vmem %s28_s16, 64  ;;  %p1568_p8 = scmp.lt.s32.totalorder %s28_s16, %s28_s16 }
  0x4e   :  { %p1564_p7 = scmp.ne.s32.totalorder %s28_s16, %s1563_s12  ;;  %p1569_p9 = scmp.lt.s32.totalorder %s1563_s12, %s1563_s12 }
  0x50   :  { %p1570_p10 = por %p1569_p9, %p1568_p8 }
  0x52   :  { %p1571_p11 = pnand %p1570_p10, %p1564_p7 }
  0x54   :  { %1574 = shalt.err (!%p1571_p11)
}
  0x55   :  { %30 = dma.hbm_to_vmem [thread:$0]  %s2014_s0, 64, %s28_s16, [#allocation3]  }
  0x56   :  { %s1704_s15 = smov [#allocation7]   ;;  %s1705_s18 = smov [#allocation10]  }
  0x57   :  { %s48_s17 = sshll.u32 %s1704_s15, 4  ;;  %s72_s1 = sshll.u32 %s1705_s18, 4  ;;  %s49_s17 = int_to_ptr.vmem [resolvable:$true] %s48_s17  ;;  %s73_s1 = int_to_ptr.vmem [resolvable:$true] %s72_s1 }
  0x58   :  { %s1575_s20 = scalar_lea.hbm %s2016_s2, 1024 }
  0x59   :  { %p1576_p12 = scmp.ne.s32.totalorder %s2016_s2, %s1575_s20  ;;  %p1579_p13 = scmp.lt.u32.totalorder %s1575_s20, %s2016_s2 }
  0x5b   :  { %p1581_p0 = pnand %p1579_p13, %p1576_p12 }
  0x5d   :  { %1584 = shalt.err (!%p1581_p0)
}
  0x5e   :  { %s1585_s0 = scalar_lea.vmem %s49_s17, 1024  ;;  %p1590_p2 = scmp.lt.s32.totalorder %s49_s17, %s49_s17 }
  0x5f   :  { %p1586_p1 = scmp.ne.s32.totalorder %s49_s17, %s1585_s0  ;;  %p1591_p3 = scmp.lt.s32.totalorder %s1585_s0, %s1585_s0 }
  0x61   :  { %p1592_p4 = por %p1591_p3, %p1590_p2 }
  0x63   :  { %p1593_p5 = pnand %p1592_p4, %p1586_p1 }
  0x65   :  { %1596 = shalt.err (!%p1593_p5)
}
  0x66   :  { %54 = dma.hbm_to_vmem [thread:$0]  %s2016_s2, 1024, %s49_s17, [#allocation6], %s1698_s23, %s1698_s23, %s1699_s24  }
  0x67   :  { %s1597_s29 = scalar_lea.hbm %s2018_s4, 1024 }
  0x68   :  { %p1598_p6 = scmp.ne.s32.totalorder %s2018_s4, %s1597_s29  ;;  %p1601_p7 = scmp.lt.u32.totalorder %s1597_s29, %s2018_s4 }
  0x6a   :  { %p1603_p8 = pnand %p1601_p7, %p1598_p6 }
  0x6c   :  { %1606 = shalt.err (!%p1603_p8)
}
  0x6d   :  { %s1607_s7 = scalar_lea.vmem %s73_s1, 1024  ;;  %p1612_p10 = scmp.lt.s32.totalorder %s73_s1, %s73_s1 }
  0x6e   :  { %p1608_p9 = scmp.ne.s32.totalorder %s73_s1, %s1607_s7  ;;  %p1613_p11 = scmp.lt.s32.totalorder %s1607_s7, %s1607_s7 }
  0x70   :  { %p1614_p12 = por %p1613_p11, %p1612_p10 }
  0x72   :  { %p1615_p13 = pnand %p1614_p12, %p1608_p9 }
  0x74   :  { %1618 = shalt.err (!%p1615_p13)
}
  0x75   :  { %78 = dma.hbm_to_vmem [thread:$0]  %s2018_s4, 1024, %s73_s1, [#allocation9], %s1698_s23, %s1698_s23, %s1699_s24  }
  0x76   :  { %s1706_s15 = smov [#allocation13]   ;;  %s1707_s18 = smov [#allocation16]  }
  0x77   :  { %s96_s17 = sshll.u32 %s1706_s15, 4  ;;  %s120_s14 = sshll.u32 %s1707_s18, 4  ;;  %s97_s17 = int_to_ptr.vmem [resolvable:$true] %s96_s17  ;;  %s121_s14 = int_to_ptr.vmem [resolvable:$true] %s120_s14 }
  0x78   :  { %s1619_s21 = scalar_lea.hbm %s2020_s6, 1024 }
  0x79   :  { %p1620_p0 = scmp.ne.s32.totalorder %s2020_s6, %s1619_s21  ;;  %p1623_p1 = scmp.lt.u32.totalorder %s1619_s21, %s2020_s6 }
  0x7b   :  { %p1625_p2 = pnand %p1623_p1, %p1620_p0 }
  0x7d   :  { %1628 = shalt.err (!%p1625_p2)
}
  0x7e   :  { %s1629_s4 = scalar_lea.vmem %s97_s17, 1024  ;;  %p1634_p4 = scmp.lt.s32.totalorder %s97_s17, %s97_s17 }
  0x7f   :  { %p1630_p3 = scmp.ne.s32.totalorder %s97_s17, %s1629_s4  ;;  %p1635_p5 = scmp.lt.s32.totalorder %s1629_s4, %s1629_s4 }
  0x81   :  { %p1636_p6 = por %p1635_p5, %p1634_p4 }
  0x83   :  { %p1637_p7 = pnand %p1636_p6, %p1630_p3 }
  0x85   :  { %1640 = shalt.err (!%p1637_p7)
}
  0x86   :  { %102 = dma.hbm_to_vmem [thread:$0]  %s2020_s6, 1024, %s97_s17, [#allocation12], %s1698_s23, %s1698_s23, %s1699_s24  }
  0x87   :  { %s1641_s27 = scalar_lea.hbm %s2022_s8, 1024 }
  0x88   :  { %p1642_p8 = scmp.ne.s32.totalorder %s2022_s8, %s1641_s27  ;;  %p1645_p9 = scmp.lt.u32.totalorder %s1641_s27, %s2022_s8 }
  0x8a   :  { %p1647_p10 = pnand %p1645_p9, %p1642_p8 }
  0x8c   :  { %1650 = shalt.err (!%p1647_p10)
}
  0x8d   :  { %s1651_s12 = scalar_lea.vmem %s121_s14, 1024  ;;  %p1656_p12 = scmp.lt.s32.totalorder %s121_s14, %s121_s14 }
  0x8e   :  { %p1652_p11 = scmp.ne.s32.totalorder %s121_s14, %s1651_s12  ;;  %p1657_p13 = scmp.lt.s32.totalorder %s1651_s12, %s1651_s12 }
  0x90   :  { %p1658_p0 = por %p1657_p13, %p1656_p12 }
  0x92   :  { %p1659_p1 = pnand %p1658_p0, %p1652_p11 }
  0x94   :  { %1662 = shalt.err (!%p1659_p1)
}
  0x95   :  { %126 = dma.hbm_to_vmem [thread:$0]  %s2022_s8, 1024, %s121_s14, [#allocation15], %s1698_s23, %s1698_s23, %s1699_s24  }
  0x96   :  { %1685 = dma.done.wait [#allocation3], 64  }
  0x97   :  { %1686 = vsyncadd [#allocation3], 4294967232 }
  0x98   :  { %1687 = dma.done.wait [#allocation6], 2048  }
  0x99   :  { %1688 = vsyncadd [#allocation6], 4294965248 }
  0x9a   :  { %1689 = dma.done.wait [#allocation9], 2048  }
  0x9b   :  { %1690 = vsyncadd [#allocation9], 4294965248 }
  0x9c   :  { %1691 = dma.done.wait [#allocation12], 2048  }
  0x9d   :  { %1692 = vsyncadd [#allocation12], 4294965248 }
  0x9e   :  { %1693 = dma.done.wait [#allocation15], 2048  }
  0x9f   :  { %1694 = vsyncadd [#allocation15], 4294965248  ;;  %v1708_v0 = vmov 0.0   ;;  %vm1709_vm0 = vmmov 0   ;;  %v1401_v1 = vld [vmem:[#allocation5] sm:$0xff]   ;;  %v1402_v2 = vld [vmem:[#allocation5 + $0x8] sm:$0xff]  }
  0xa0   :  { %1227 = vmatprep.subr.bf16.mxu0 %v1708_v0  ;;  %1243 = vmatprep.mubr.msk.bf16.mxu0 %vm1709_vm0, %v1708_v0  ;;  %v1403_v3 = vld [vmem:[#allocation5 + $0x10] sm:$0xff]   ;;  %v1409_v4 = vld [vmem:[#allocation7] sm:$0xff]   ;;  %v1404_v5 = vld [vmem:[#allocation5 + $0x18] sm:$0xff]   ;;  %s1710_s4 = smov [#allocation17]  }
  0xa1   :  { %1247 = vmatprep.subr.bf16.mxu1 %v1708_v0  ;;  %1263 = vmatprep.mubr.msk.bf16.mxu1 %vm1709_vm0, %v1708_v0  ;;  %v1410_v6 = vld [vmem:[#allocation7 + $0x8] sm:$0xff]   ;;  %v1405_v7 = vld [vmem:[#allocation5 + $0x20] sm:$0xff]   ;;  %v1411_v8 = vld [vmem:[#allocation7 + $0x10] sm:$0xff]   ;;  %s1070_s1 = sshll.u32 %s1710_s4, 4  ;;  %s1071_s1 = int_to_ptr.vmem [resolvable:$true] %s1070_s1 }
  0xa2   :  { %1228 = vmatpush3.bf16.msra.mxu0 %v1401_v1  ;;  %1248 = vmatpush3.bf16.msra.mxu1 %v1409_v4  ;;  %v1406_v9 = vld [vmem:[#allocation5 + $0x28] sm:$0xff]   ;;  %v1412_v10 = vld [vmem:[#allocation7 + $0x18] sm:$0xff]   ;;  %v1407_v11 = vld [vmem:[#allocation5 + $0x30] sm:$0xff]   ;;  %s1663_s16 = scalar_lea.vmem %s1071_s1, 640  ;;  %p1668_p3 = scmp.lt.s32.totalorder %s1071_s1, %s1071_s1 }
  0xa3   :  { %1229 = vmatprep.subr.bf16.mxu0 %v1708_v0  ;;  %1249 = vmatprep.subr.bf16.mxu1 %v1708_v0  ;;  %v1413_v12 = vld [vmem:[#allocation7 + $0x20] sm:$0xff]   ;;  %v1408_v13 = vld [vmem:[#allocation5 + $0x38] sm:$0xff]   ;;  %v1414_v14 = vld [vmem:[#allocation7 + $0x28] sm:$0xff]   ;;  %p1664_p2 = scmp.ne.s32.totalorder %s1071_s1, %s1663_s16  ;;  %p1669_p4 = scmp.lt.s32.totalorder %s1663_s16, %s1663_s16 }
  0xa4   :  { %v157_v15 = vld [vmem:[#allocation2] sm:$0xf]  ;;  %v1415_v16 = vld [vmem:[#allocation7 + $0x30] sm:$0xff]   ;;  %v1417_v18 = vld [vmem:[#allocation8] sm:$0xff]  }
  0xa5   :  { %v1416_v17 = vld [vmem:[#allocation7 + $0x38] sm:$0xff]   ;;  %v1418_v19 = vld [vmem:[#allocation8 + $0x8] sm:$0xff]   ;;  %v1419_v20 = vld [vmem:[#allocation8 + $0x10] sm:$0xff]   ;;  %p1670_p5 = por %p1669_p4, %p1668_p3 }
  0xa6   :  { %1230 = vmatpush3.bf16.msra.mxu0 %v1402_v2  ;;  %1250 = vmatpush3.bf16.msra.mxu1 %v1410_v6  ;;  %v1420_v21 = vld [vmem:[#allocation8 + $0x18] sm:$0xff]   ;;  %v1421_v22 = vld [vmem:[#allocation8 + $0x20] sm:$0xff]   ;;  %v1422_v23 = vld [vmem:[#allocation8 + $0x28] sm:$0xff]  }
  0xa7   :  { %1231 = vmatprep.subr.bf16.mxu0 %v1708_v0  ;;  %1251 = vmatprep.subr.bf16.mxu1 %v1708_v0  ;;  %v1083_v24 = vld [vmem:[%s2023_s9] ss:$0 sm:$0xff]  ;;  %v1424_v33 = vld [vmem:[#allocation8 + $0x38] sm:$0xff]   ;;  %v1425_v34 = vld [vmem:[#allocation10] sm:$0xff]   ;;  %p1671_p6 = pnand %p1670_p5, %p1664_p2 }
  0xa8   :  { %v1423_v32 = vld [vmem:[#allocation8 + $0x30] sm:$0xff]   ;;  %v1426_v35 = vld [vmem:[#allocation10 + $0x8] sm:$0xff]   ;;  %v1428_v37 = vld [vmem:[#allocation10 + $0x18] sm:$0xff]  }
  0xa9   :  { %v1427_v36 = vld [vmem:[#allocation10 + $0x10] sm:$0xff]   ;;  %v1429_v38 = vld [vmem:[#allocation10 + $0x20] sm:$0xff]   ;;  %v1430_v39 = vld [vmem:[#allocation10 + $0x28] sm:$0xff]  }
  0xaa   :  { %1232 = vmatpush3.bf16.msra.mxu0 %v1403_v3  ;;  %1252 = vmatpush3.bf16.msra.mxu1 %v1411_v8  ;;  %v1092_v40 = vld [vmem:[%s2023_s9 + $0x1] ss:$0 sm:$0xff]  ;;  %v1432_v49 = vld [vmem:[#allocation10 + $0x38] sm:$0xff]   ;;  %v1433_v50 = vld [vmem:[#allocation11] sm:$0xff]  }
  0xab   :  { %1233 = vmatprep.subr.bf16.mxu0 %v1708_v0  ;;  %1253 = vmatprep.subr.bf16.mxu1 %v1708_v0  ;;  %v1431_v48 = vld [vmem:[#allocation10 + $0x30] sm:$0xff]   ;;  %v1434_v51 = vld [vmem:[#allocation11 + $0x8] sm:$0xff]   ;;  %v1436_v53 = vld [vmem:[#allocation11 + $0x18] sm:$0xff]  }
  0xac   :  { %v1435_v52 = vld [vmem:[#allocation11 + $0x10] sm:$0xff]   ;;  %v1437_v54 = vld [vmem:[#allocation11 + $0x20] sm:$0xff]   ;;  %v1438_v55 = vld [vmem:[#allocation11 + $0x28] sm:$0xff]  }
  0xad   :  { %v1439_v56 = vld [vmem:[#allocation11 + $0x30] sm:$0xff]   ;;  %v1440_v2 = vld [vmem:[#allocation11 + $0x38] sm:$0xff]   ;;  %v1441_v3 = vld [vmem:[#allocation13] sm:$0xff]  }
  0xae   :  { %1234 = vmatpush3.bf16.msra.mxu0 %v1404_v5  ;;  %1254 = vmatpush3.bf16.msra.mxu1 %v1412_v10  ;;  %v1101_v57 = vld [vmem:[%s2023_s9 + $0x2] ss:$0 sm:$0xff]  ;;  %v1442_v4 = vld [vmem:[#allocation13 + $0x8] sm:$0xff]   ;;  %v1444_v6 = vld [vmem:[#allocation13 + $0x18] sm:$0xff]  }
  0xaf   :  { %1235 = vmatprep.subr.bf16.mxu0 %v1708_v0  ;;  %1255 = vmatprep.subr.bf16.mxu1 %v1708_v0  ;;  %v1443_v5 = vld [vmem:[#allocation13 + $0x10] sm:$0xff]   ;;  %v1446_v8 = vld [vmem:[#allocation13 + $0x28] sm:$0xff]  }
  0xb2   :  { %1236 = vmatpush3.bf16.msra.mxu0 %v1405_v7  ;;  %1256 = vmatpush3.bf16.msra.mxu1 %v1413_v12  ;;  %v1445_v7 = vld [vmem:[#allocation13 + $0x20] sm:$0xff]  }
  0xb3   :  { %1237 = vmatprep.subr.bf16.mxu0 %v1708_v0  ;;  %1257 = vmatprep.subr.bf16.mxu1 %v1708_v0 }
  0xb6   :  { %1238 = vmatpush3.bf16.msra.mxu0 %v1406_v9  ;;  %1258 = vmatpush3.bf16.msra.mxu1 %v1414_v14  ;;  %v1110_v9 = vld [vmem:[%s2023_s9 + $0x3] ss:$0 sm:$0xff] }
  0xb7   :  { %1239 = vmatprep.subr.bf16.mxu0 %v1708_v0  ;;  %1259 = vmatprep.subr.bf16.mxu1 %v1708_v0 }
  0xba   :  { %1240 = vmatpush3.bf16.msra.mxu0 %v1407_v11  ;;  %1260 = vmatpush3.bf16.msra.mxu1 %v1415_v16  ;;  %v1447_v16 = vld [vmem:[#allocation13 + $0x30] sm:$0xff]  }
  0xbb   :  { %1241 = vmatprep.subr.bf16.mxu0 %v1708_v0  ;;  %1261 = vmatprep.subr.bf16.mxu1 %v1708_v0 }
  0xbe   :  { %1242 = vmatpush3.bf16.msra.mxu0 %v1408_v13  ;;  %1262 = vmatpush3.bf16.msra.mxu1 %v1416_v17  ;;  %v1448_v17 = vld [vmem:[#allocation13 + $0x38] sm:$0xff]  }
  0xbf   :  { %1267 = vmatprep.subr.bf16.mxu0 %v1708_v0  ;;  %1287 = vmatprep.subr.bf16.mxu1 %v1708_v0 }
  0xc1   :  { %1244 = vmatmul.mubr.bf16.vlgmr.msra.gmra.mrb[0].mxu0 %v157_v15 }
  0xc2   :  { %1283 = vmatprep.mubr.msk.bf16.mxu0 %vm1709_vm0, %v1708_v0  ;;  %1268 = vmatpush3.bf16.msra.mxu0 %v1417_v18  ;;  %v1449_v18 = vld [vmem:[#allocation14] sm:$0xff]  }
  0xc3   :  { %1269 = vmatprep.subr.bf16.mxu0 %v1708_v0 }
  0xc6   :  { %1270 = vmatpush3.bf16.msra.mxu0 %v1418_v19  ;;  %v1450_v19 = vld [vmem:[#allocation14 + $0x8] sm:$0xff]  }
  0xc7   :  { %1271 = vmatprep.subr.bf16.mxu0 %v1708_v0 }
  0xca   :  { %1272 = vmatpush3.bf16.msra.mxu0 %v1419_v20  ;;  %v1451_v20 = vld [vmem:[#allocation14 + $0x10] sm:$0xff]  }
  0xcb   :  { %1273 = vmatprep.subr.bf16.mxu0 %v1708_v0 }
  0xce   :  { %1274 = vmatpush3.bf16.msra.mxu0 %v1420_v21  ;;  %v1452_v21 = vld [vmem:[#allocation14 + $0x18] sm:$0xff]  }
  0xcf   :  { %1275 = vmatprep.subr.bf16.mxu0 %v1708_v0 }
  0xd2   :  { %1276 = vmatpush3.bf16.msra.mxu0 %v1421_v22  ;;  %v1453_v22 = vld [vmem:[#allocation14 + $0x20] sm:$0xff]  }
  0xd3   :  { %1277 = vmatprep.subr.bf16.mxu0 %v1708_v0 }
  0xd6   :  { %1278 = vmatpush3.bf16.msra.mxu0 %v1422_v23  ;;  %v1454_v23 = vld [vmem:[#allocation14 + $0x28] sm:$0xff]  }
  0xd7   :  { %1279 = vmatprep.subr.bf16.mxu0 %v1708_v0 }
  0xda   :  { %1280 = vmatpush3.bf16.msra.mxu0 %v1423_v32  ;;  %v1455_v32 = vld [vmem:[#allocation14 + $0x30] sm:$0xff]  }
  0xdb   :  { %1281 = vmatprep.subr.bf16.mxu0 %v1708_v0 }
  0xde   :  { %1282 = vmatpush3.bf16.msra.mxu0 %v1424_v33  ;;  %v1456_v33 = vld [vmem:[#allocation14 + $0x38] sm:$0xff]  }
  0xdf   :  { %1307 = vmatprep.subr.bf16.mxu0 %v1708_v0 }
 0x194   :  { %v263_v25 = vpop.f32.mrb[0].mxu0 }
 0x195   :  { %v264_v26 = vadd.f32 %v1083_v24, %v263_v25  ;;  %v1245_v27 = vpop.f32.mrb[1].mxu0  ;;  %v1119_v24 = vld [vmem:[%s2023_s9 + $0x4] ss:$0 sm:$0xff] }
 0x196   :  { %v266_v28 = vpop.f32.mrb[2].mxu0 }
 0x197   :  { %v269_v29 = vmax.f32 %v264_v26, 0.0  ;;  %v1246_v30 = vpop.f32.mrb[3].mxu0 }
 0x199   :  { %270 = vst [vmem:[#allocation17 + $0x8] sm:$0xff] %v269_v29  ;;  %v271_v31 = vpack.c.bf16 %v269_v29, %v269_v29 }
 0x19b   :  { %1264 = vmatmul.mubr.bf16.vlgmr.msra.gmra.mrb[0].mxu1 %v271_v31 }
 0x19c   :  { %1303 = vmatprep.mubr.msk.bf16.mxu1 %vm1709_vm0, %v1708_v0  ;;  %1288 = vmatpush3.bf16.msra.mxu1 %v1425_v34  ;;  %v1457_v34 = vld [vmem:[#allocation16] sm:$0xff]  }
 0x19d   :  { %1289 = vmatprep.subr.bf16.mxu1 %v1708_v0 }
 0x1a0   :  { %1290 = vmatpush3.bf16.msra.mxu1 %v1426_v35  ;;  %v1458_v35 = vld [vmem:[#allocation16 + $0x8] sm:$0xff]  }
 0x1a1   :  { %1291 = vmatprep.subr.bf16.mxu1 %v1708_v0 }
 0x1a4   :  { %1292 = vmatpush3.bf16.msra.mxu1 %v1427_v36  ;;  %v1459_v36 = vld [vmem:[#allocation16 + $0x10] sm:$0xff]  }
 0x1a5   :  { %1293 = vmatprep.subr.bf16.mxu1 %v1708_v0 }
 0x1a8   :  { %1294 = vmatpush3.bf16.msra.mxu1 %v1428_v37  ;;  %v1460_v37 = vld [vmem:[#allocation16 + $0x18] sm:$0xff]  }
 0x1a9   :  { %1295 = vmatprep.subr.bf16.mxu1 %v1708_v0 }
 0x1ac   :  { %1296 = vmatpush3.bf16.msra.mxu1 %v1429_v38  ;;  %v1461_v38 = vld [vmem:[#allocation16 + $0x20] sm:$0xff]  }
 0x1ad   :  { %1297 = vmatprep.subr.bf16.mxu1 %v1708_v0 }
 0x1b0   :  { %1298 = vmatpush3.bf16.msra.mxu1 %v1430_v39  ;;  %v1462_v39 = vld [vmem:[#allocation16 + $0x28] sm:$0xff]  }
 0x1b1   :  { %1299 = vmatprep.subr.bf16.mxu1 %v1708_v0 }
 0x1b4   :  { %1300 = vmatpush3.bf16.msra.mxu1 %v1431_v48  ;;  %v1463_v48 = vld [vmem:[#allocation16 + $0x30] sm:$0xff]  }
 0x1b5   :  { %1301 = vmatprep.subr.bf16.mxu1 %v1708_v0 }
 0x1b8   :  { %1302 = vmatpush3.bf16.msra.mxu1 %v1432_v49  ;;  %v1464_v49 = vld [vmem:[#allocation16 + $0x38] sm:$0xff]  }
 0x1b9   :  { %1327 = vmatprep.subr.bf16.mxu1 %v1708_v0 }
 0x26e   :  { %v377_v41 = vpop.f32.mrb[0].mxu1 }
 0x26f   :  { %v378_v42 = vadd.f32 %v1092_v40, %v377_v41  ;;  %v1265_v43 = vpop.f32.mrb[1].mxu1  ;;  %v1128_v40 = vld [vmem:[%s2023_s9 + $0x5] ss:$0 sm:$0xff] }
 0x270   :  { %v380_v44 = vpop.f32.mrb[2].mxu1 }
 0x271   :  { %v383_v45 = vmax.f32 %v378_v42, 0.0  ;;  %v1266_v46 = vpop.f32.mrb[3].mxu1 }
 0x273   :  { %384 = vst [vmem:[#allocation17 + $0x10] sm:$0xff] %v383_v45  ;;  %v385_v47 = vpack.c.bf16 %v383_v45, %v383_v45 }
 0x275   :  { %1284 = vmatmul.mubr.bf16.vlgmr.msra.gmra.mrb[4].mxu0 %v385_v47 }
 0x276   :  { %1323 = vmatprep.mubr.msk.bf16.mxu0 %vm1709_vm0, %v1708_v0  ;;  %1308 = vmatpush3.bf16.msra.mxu0 %v1433_v50  ;;  %v1137_v50 = vld [vmem:[%s2023_s9 + $0x6] ss:$0 sm:$0xff] }
 0x277   :  { %1309 = vmatprep.subr.bf16.mxu0 %v1708_v0 }
 0x27a   :  { %1310 = vmatpush3.bf16.msra.mxu0 %v1434_v51 }
 0x27b   :  { %1311 = vmatprep.subr.bf16.mxu0 %v1708_v0 }
 0x27e   :  { %1312 = vmatpush3.bf16.msra.mxu0 %v1435_v52 }
 0x27f   :  { %1313 = vmatprep.subr.bf16.mxu0 %v1708_v0 }
 0x282   :  { %1314 = vmatpush3.bf16.msra.mxu0 %v1436_v53 }
 0x283   :  { %1315 = vmatprep.subr.bf16.mxu0 %v1708_v0 }
 0x286   :  { %1316 = vmatpush3.bf16.msra.mxu0 %v1437_v54 }
 0x287   :  { %1317 = vmatprep.subr.bf16.mxu0 %v1708_v0 }
 0x28a   :  { %1318 = vmatpush3.bf16.msra.mxu0 %v1438_v55 }
 0x28b   :  { %1319 = vmatprep.subr.bf16.mxu0 %v1708_v0 }
 0x28e   :  { %1320 = vmatpush3.bf16.msra.mxu0 %v1439_v56 }
 0x28f   :  { %1321 = vmatprep.subr.bf16.mxu0 %v1708_v0 }
 0x292   :  { %1322 = vmatpush3.bf16.msra.mxu0 %v1440_v2 }
 0x293   :  { %1347 = vmatprep.subr.bf16.mxu0 %v1708_v0 }
 0x348   :  { %v491_v58 = vpop.f32.mrb[4].mxu0 }
 0x349   :  { %v492_v59 = vadd.f32 %v1101_v57, %v491_v58  ;;  %v1285_v60 = vpop.f32.mrb[5].mxu0  ;;  %v1146_v58 = vld [vmem:[%s2023_s9 + $0x7] ss:$0 sm:$0xff] }
 0x34a   :  { %v494_v61 = vpop.f32.mrb[6].mxu0 }
 0x34b   :  { %v497_v62 = vmax.f32 %v492_v59, 0.0  ;;  %v1286_v63 = vpop.f32.mrb[7].mxu0 }
 0x34d   :  { %498 = vst [vmem:[#allocation17 + $0x18] sm:$0xff] %v497_v62  ;;  %v499_v1 = vpack.c.bf16 %v497_v62, %v497_v62 }
 0x34f   :  { %1304 = vmatmul.mubr.bf16.vlgmr.msra.gmra.mrb[4].mxu1 %v499_v1 }
 0x350   :  { %1343 = vmatprep.mubr.msk.bf16.mxu1 %vm1709_vm0, %v1708_v0  ;;  %1328 = vmatpush3.bf16.msra.mxu1 %v1441_v3 }
 0x351   :  { %1329 = vmatprep.subr.bf16.mxu1 %v1708_v0 }
 0x354   :  { %1330 = vmatpush3.bf16.msra.mxu1 %v1442_v4 }
 0x355   :  { %1331 = vmatprep.subr.bf16.mxu1 %v1708_v0 }
 0x358   :  { %1332 = vmatpush3.bf16.msra.mxu1 %v1443_v5 }
 0x359   :  { %1333 = vmatprep.subr.bf16.mxu1 %v1708_v0 }
 0x35c   :  { %1334 = vmatpush3.bf16.msra.mxu1 %v1444_v6 }
 0x35d   :  { %1335 = vmatprep.subr.bf16.mxu1 %v1708_v0 }
 0x360   :  { %1336 = vmatpush3.bf16.msra.mxu1 %v1445_v7 }
 0x361   :  { %1337 = vmatprep.subr.bf16.mxu1 %v1708_v0 }
 0x364   :  { %1338 = vmatpush3.bf16.msra.mxu1 %v1446_v8 }
 0x365   :  { %1339 = vmatprep.subr.bf16.mxu1 %v1708_v0 }
 0x368   :  { %1340 = vmatpush3.bf16.msra.mxu1 %v1447_v16 }
 0x369   :  { %1341 = vmatprep.subr.bf16.mxu1 %v1708_v0 }
 0x36c   :  { %1342 = vmatpush3.bf16.msra.mxu1 %v1448_v17 }
 0x36d   :  { %1367 = vmatprep.subr.bf16.mxu1 %v1708_v0 }
 0x422   :  { %v605_v10 = vpop.f32.mrb[4].mxu1 }
 0x423   :  { %v606_v11 = vadd.f32 %v1110_v9, %v605_v10  ;;  %v1305_v12 = vpop.f32.mrb[5].mxu1 }
 0x424   :  { %v608_v13 = vpop.f32.mrb[6].mxu1 }
 0x425   :  { %611 = vst [vmem:[#allocation17 + $0x20] sm:$0xff] %v606_v11  ;;  %v612_v14 = vpack.c.bf16 %v606_v11, %v606_v11  ;;  %v1306_v15 = vpop.f32.mrb[7].mxu1 }
 0x427   :  { %1324 = vmatmul.mubr.bf16.vlgmr.msra.gmra.mrb[8].mxu0 %v612_v14 }
 0x428   :  { %1363 = vmatprep.mubr.msk.bf16.mxu0 %vm1709_vm0, %v1708_v0  ;;  %1348 = vmatpush3.bf16.msra.mxu0 %v1449_v18 }
 0x429   :  { %1349 = vmatprep.subr.bf16.mxu0 %v1708_v0 }
 0x42c   :  { %1350 = vmatpush3.bf16.msra.mxu0 %v1450_v19 }
 0x42d   :  { %1351 = vmatprep.subr.bf16.mxu0 %v1708_v0 }
 0x430   :  { %1352 = vmatpush3.bf16.msra.mxu0 %v1451_v20 }
 0x431   :  { %1353 = vmatprep.subr.bf16.mxu0 %v1708_v0 }
 0x434   :  { %1354 = vmatpush3.bf16.msra.mxu0 %v1452_v21 }
 0x435   :  { %1355 = vmatprep.subr.bf16.mxu0 %v1708_v0 }
 0x438   :  { %1356 = vmatpush3.bf16.msra.mxu0 %v1453_v22 }
 0x439   :  { %1357 = vmatprep.subr.bf16.mxu0 %v1708_v0 }
 0x43c   :  { %1358 = vmatpush3.bf16.msra.mxu0 %v1454_v23 }
 0x43d   :  { %1359 = vmatprep.subr.bf16.mxu0 %v1708_v0 }
 0x440   :  { %1360 = vmatpush3.bf16.msra.mxu0 %v1455_v32 }
 0x441   :  { %1361 = vmatprep.subr.bf16.mxu0 %v1708_v0 }
 0x444   :  { %1362 = vmatpush3.bf16.msra.mxu0 %v1456_v33 }
 0x4fa   :  { %v718_v25 = vpop.f32.mrb[8].mxu0 }
 0x4fb   :  { %v719_v26 = vadd.f32 %v1119_v24, %v718_v25  ;;  %v1325_v27 = vpop.f32.mrb[9].mxu0 }
 0x4fc   :  { %v721_v28 = vpop.f32.mrb[10].mxu0 }
 0x4fd   :  { %v724_v29 = vmax.f32 %v719_v26, 0.0  ;;  %v1326_v30 = vpop.f32.mrb[11].mxu0 }
 0x4ff   :  { %v725_v31 = vpack.c.bf16 %v724_v29, %v724_v29 }
 0x501   :  { %1344 = vmatmul.mubr.bf16.vlgmr.msra.gmra.mrb[8].mxu1 %v725_v31 }
 0x502   :  { %1383 = vmatprep.mubr.msk.bf16.mxu1 %vm1709_vm0, %v1708_v0  ;;  %1368 = vmatpush3.bf16.msra.mxu1 %v1457_v34 }
 0x503   :  { %1369 = vmatprep.subr.bf16.mxu1 %v1708_v0 }
 0x506   :  { %1370 = vmatpush3.bf16.msra.mxu1 %v1458_v35 }
 0x507   :  { %1371 = vmatprep.subr.bf16.mxu1 %v1708_v0 }
 0x50a   :  { %1372 = vmatpush3.bf16.msra.mxu1 %v1459_v36 }
 0x50b   :  { %1373 = vmatprep.subr.bf16.mxu1 %v1708_v0 }
 0x50e   :  { %1374 = vmatpush3.bf16.msra.mxu1 %v1460_v37 }
 0x50f   :  { %1375 = vmatprep.subr.bf16.mxu1 %v1708_v0 }
 0x512   :  { %1376 = vmatpush3.bf16.msra.mxu1 %v1461_v38 }
 0x513   :  { %1377 = vmatprep.subr.bf16.mxu1 %v1708_v0 }
 0x516   :  { %1378 = vmatpush3.bf16.msra.mxu1 %v1462_v39 }
 0x517   :  { %1379 = vmatprep.subr.bf16.mxu1 %v1708_v0 }
 0x51a   :  { %1380 = vmatpush3.bf16.msra.mxu1 %v1463_v48 }
 0x51b   :  { %1381 = vmatprep.subr.bf16.mxu1 %v1708_v0 }
 0x51e   :  { %1382 = vmatpush3.bf16.msra.mxu1 %v1464_v49 }
 0x5d4   :  { %v831_v41 = vpop.f32.mrb[8].mxu1 }
 0x5d5   :  { %v832_v42 = vadd.f32 %v1128_v40, %v831_v41  ;;  %v1345_v43 = vpop.f32.mrb[9].mxu1 }
 0x5d6   :  { %v834_v44 = vpop.f32.mrb[10].mxu1 }
 0x5d7   :  { %v837_v45 = vmax.f32 %v832_v42, 0.0  ;;  %v1346_v46 = vpop.f32.mrb[11].mxu1 }
 0x5d9   :  { %v838_v47 = vpack.c.bf16 %v837_v45, %v837_v45 }
 0x5db   :  { %1364 = vmatmul.mubr.bf16.vlgmr.msra.gmra.mrb[12].mxu0 %v838_v47 }
 0x6ae   :  { %v944_v51 = vpop.f32.mrb[12].mxu0 }
 0x6af   :  { %v945_v52 = vadd.f32 %v1137_v50, %v944_v51  ;;  %v1365_v53 = vpop.f32.mrb[13].mxu0 }
 0x6b0   :  { %v947_v54 = vpop.f32.mrb[14].mxu0 }
 0x6b1   :  { %v950_v55 = vmax.f32 %v945_v52, 0.0  ;;  %v1366_v56 = vpop.f32.mrb[15].mxu0 }
 0x6b3   :  { %v951_v57 = vpack.c.bf16 %v950_v55, %v950_v55 }
 0x6b5   :  { %1384 = vmatmul.mubr.bf16.vlgmr.msra.gmra.mrb[12].mxu1 %v951_v57 }
 0x788   :  { %v1057_v0 = vpop.f32.mrb[12].mxu1 }
 0x789   :  { %v1058_v59 = vadd.f32 %v1146_v58, %v1057_v0  ;;  %v1385_v60 = vpop.f32.mrb[13].mxu1 }
 0x78a   :  { %v1060_v61 = vpop.f32.mrb[14].mxu1 }
 0x78b   :  { %1063 = vst [vmem:[#allocation17] sm:$0xff] %v1058_v59  ;;  %v1386_v62 = vpop.f32.mrb[15].mxu1 }
 0x78c   :  { %1674 = shalt.err (!%p1671_p6)
}
 0x78d   :  { %s1675_s9 = scalar_lea.hbm %s2024_s10, 640 }
 0x78e   :  { %p1676_p7 = scmp.ne.s32.totalorder %s2024_s10, %s1675_s9  ;;  %p1679_p8 = scmp.lt.u32.totalorder %s1675_s9, %s2024_s10 }
 0x790   :  { %p1681_p9 = pnand %p1679_p8, %p1676_p7 }
 0x792   :  { %1684 = shalt.err (!%p1681_p9)
}
 0x793   :  { %1073 = dma.vmem_to_hbm [thread:$0]  %s1071_s1, 640, %s2024_s10, [#allocation4]  }
 0x794   :  { %1695 = dma.done.wait [#allocation4], 640  }
 0x795   :  { %1696 = vsyncadd [#allocation4], 4294966656 }
 0x796   :  { %1077 = vsyncpa [#allocation3], 1 }
 0x797   :  { %1078 = vsyncpa [#allocation6], 1 }
 0x798   :  { %1079 = vsyncpa [#allocation9], 1 }
 0x799   :  { %1080 = vsyncpa [#allocation12], 1 }
 0x79a   :  { %1081 = vsyncpa [#allocation15], 1 }
 0x79b   :  { %1082 = vsyncpa [#allocation4], 1 }

</bundles_post_ra>
